<compile_context>
chip_gen: v7x
topology: tpu7x:2x2x1
jax: 0.10.0
libtpu: 0.0.40
codegen_flags: <defaults>
</compile_context>

<pallas_src>
import functools

import jax
import jax.numpy as jnp
from jax.experimental import pallas as pl
from jax.experimental.pallas import tpu as pltpu


def _swap01(x):
    """(A, B, C) -> (B, A, C); minor (lane) dim untouched."""
    if hasattr(pltpu, "einshape"):
        return pltpu.einshape("abc->bac", x)
    return jnp.swapaxes(x, 0, 1)


def saa_kernel(nodes_ref, paths_ref, bias_ref,
               w_q_ref, b_q_ref, w_kv_ref, b_kv_ref,
               g_p_ref, b_p_ref,
               w_skt_ref, w_sv_ref, b_sv_ref,
               w_o_ref, b_o_ref, g_n_ref, b_n_ref,
               out_ref, attn_scratch, *, heads, eps):
    f32 = jnp.float32
    N = nodes_ref.shape[1]
    hidden = nodes_ref.shape[2]
    T = paths_ref.shape[1]          # query-row tile
    P = paths_ref.shape[3]
    H = heads
    d = hidden // H

    r0 = pl.multiple_of(pl.program_id(1) * T, T)

    x_full = nodes_ref[0].astype(f32)                        # (N, hidden)  (for K/V)
    x_tile = nodes_ref[0, pl.ds(r0, T), :].astype(f32)       # (T, hidden)  (for Q/residual)

    # ---- fused projections (MXU, f32 accumulation) ----
    kv = jnp.dot(x_full, w_kv_ref[...], preferred_element_type=f32) + b_kv_ref[...]
    k = kv[:, :hidden]                                       # (N, hidden)
    v = kv[:, hidden:]                                       # (N, hidden)
    q = jnp.dot(x_tile, w_q_ref[...], preferred_element_type=f32) + b_q_ref[...]  # scale pre-folded

    # ---- path LayerNorm (row tile only) ----
    p = paths_ref[0].astype(f32)                             # (T, N, P)
    mu_p = jnp.mean(p, axis=-1, keepdims=True)
    var_p = jnp.mean(jnp.square(p - mu_p), axis=-1, keepdims=True)
    pn = (p - mu_p) * jax.lax.rsqrt(var_p + eps)
    pn = pn * g_p_ref[...].reshape(1, 1, P) + b_p_ref[...].reshape(1, 1, P)

    # ---- per-head stacks (leading-axis stacks of column slices) ----
    q_hs = jnp.stack([q[:, h * d:(h + 1) * d] for h in range(H)], axis=0)   # (H, T, d)
    k_hs = jnp.stack([k[:, h * d:(h + 1) * d] for h in range(H)], axis=0)   # (H, N, d)
    v_hs = jnp.stack([v[:, h * d:(h + 1) * d] for h in range(H)], axis=0)   # (H, N, d)

    # content scores (MXU, batch = heads)
    s_c = jnp.einsum('htd,hnd->htn', q_hs, k_hs, preferred_element_type=f32)  # (H, T, N)

    # structural scores (MXU, batch = query rows), W_sk folded:
    #   s_s[h,t,j] = sum_p pn[t,j,p] * (q_h[t,:] @ W_sk^T)[p]
    #   (struct_k bias is constant along j -> cancels in the softmax, dropped)
    t_hs = jnp.stack(
        [jnp.dot(q[:, h * d:(h + 1) * d], w_skt_ref[...], preferred_element_type=f32)
         for h in range(H)], axis=0)                                          # (H, T, P)
    t_all = _swap01(t_hs)                                                     # (T, H, P)
    s_s = _swap01(jnp.einsum('thp,tnp->thn', t_all, pn,
                             preferred_element_type=f32))                     # (H, T, N)

    logits = s_c + s_s + bias_ref[...]                                        # bias (1, 1, N)

    m = jnp.max(logits, axis=-1, keepdims=True)
    e = jnp.exp(logits - m)
    denom = jnp.sum(e, axis=-1, keepdims=True)
    # TODO(synk): fully-masked rows (denom == 0) give NaN, same as torch's softmax.
    w = e * pl.reciprocal(denom, approx=True)                                 # (H, T, N)

    # content values (MXU, batch = heads)
    o1 = jnp.einsum('htn,hnd->htd', w, v_hs, preferred_element_type=f32)      # (H, T, d)

    # structural values (MXU, batch = query rows), W_sv folded:
    #   u[t,h,p] = sum_j w[h,t,j] * pn[t,j,p];  o2 = u @ W_sv (+ b_sv once: rows of w sum to 1)
    u = jnp.einsum('thn,tnp->thp', _swap01(w), pn, preferred_element_type=f32)  # (T, H, P)
    u_hs = _swap01(u)                                                           # (H, T, P)

    # combine heads by writing column slices of a VMEM scratch (no lane concatenate)
    for h in range(H):
        attn_scratch[:, h * d:(h + 1) * d] = (
            o1[h] + jnp.dot(u_hs[h], w_sv_ref[...], preferred_element_type=f32))
    attn = attn_scratch[...] + b_sv_ref[...]                                    # b_sv pre-tiled to (1, hidden)

    # ---- output projection + ReLU + residual + LayerNorm ----
    o = jnp.dot(attn, w_o_ref[...], preferred_element_type=f32) + b_o_ref[...]
    o = jnp.maximum(o, 0.0)
    # TODO(synk): nn.Dropout treated as identity (inference mode), no RNG dropout.
    y = x_tile + o
    mu_y = jnp.mean(y, axis=-1, keepdims=True)
    var_y = jnp.mean(jnp.square(y - mu_y), axis=-1, keepdims=True)
    out = (y - mu_y) * jax.lax.rsqrt(var_y + eps) * g_n_ref[...] + b_n_ref[...]
    out_ref[0] = out.astype(out_ref.dtype)


def _prepare_kernel_params(params, *, heads):
    """Fold / pack the torch-style parameters for the kernel."""
    hidden = params["W_q"].shape[0]
    d = hidden // heads
    scale = float(d) ** -0.5
    return {
        "w_q": params["W_q"] * scale,                       # 1/sqrt(d) folded into Q proj
        "b_q": params["b_q"] * scale,
        "w_kv": jnp.concatenate([params["W_k"], params["W_v"]], axis=1),
        "b_kv": jnp.concatenate([params["b_k"], params["b_v"]], axis=1),
        "g_p": params["g_p"], "b_p": params["b_p"],
        "w_skt": params["W_sk"].T,                          # (d, P); b_sk dropped (softmax-invariant)
        "w_sv": params["W_sv"],                             # (P, d)
        "b_sv": jnp.tile(params["b_sv"], (1, heads)),       # (1, hidden), added once after combine
        "w_o": params["W_o"], "b_o": params["b_o"],
        "g_n": params["g_n"], "b_n": params["b_n"],
    }


def structure_aware_attention_forward(nodes, bias, paths, params, *, heads,
                                      row_tile=None, eps=1e-5,
                                      input_dtype=jnp.bfloat16):
    """nodes: (B, N, hidden); bias broadcastable to (B, 1, 1, N) (masking bias);
    paths: (B, N, N, P). Returns (B, N, hidden) float32."""
    B, N, hidden = nodes.shape
    P = paths.shape[-1]
    assert hidden % heads == 0

    if row_tile is None:
        row_tile = N
        for cand in (128, 64, 32, 16, 8):     # tune per chip generation / VMEM budget
            if N % cand == 0:
                row_tile = cand
                break
    assert N % row_tile == 0
    n_row_tiles = N // row_tile

    kp = _prepare_kernel_params(params, heads=heads)

    # Compact key-wise bias (torch masking_bias shape); broadcast over heads/queries in-kernel.
    bias_c = jnp.broadcast_to(bias.astype(jnp.float32), (B, 1, 1, N)).reshape(B, 1, N)

    nodes_x = nodes.astype(input_dtype)   # bf16 DMA; upcast to f32 inside the kernel
    paths_x = paths.astype(input_dtype)

    def resident(arr):
        nd = arr.ndim
        return pl.BlockSpec(tuple(arr.shape), lambda b, i, _nd=nd: (0,) * _nd)

    weights = [kp["w_q"], kp["b_q"], kp["w_kv"], kp["b_kv"],
               kp["g_p"], kp["b_p"], kp["w_skt"], kp["w_sv"], kp["b_sv"],
               kp["w_o"], kp["b_o"], kp["g_n"], kp["b_n"]]

    kernel = functools.partial(saa_kernel, heads=heads, eps=eps)

    out = pl.pallas_call(
        kernel,
        out_shape=jax.ShapeDtypeStruct((B, N, hidden), jnp.float32),
        grid_spec=pltpu.PrefetchScalarGridSpec(
            num_scalar_prefetch=0,
            grid=(B, n_row_tiles),
            in_specs=[
                pl.BlockSpec((1, N, hidden), lambda b, i: (b, 0, 0)),          # nodes (full, per batch)
                pl.BlockSpec((1, row_tile, N, P), lambda b, i: (b, i, 0, 0)),  # paths (query-row tile)
                pl.BlockSpec((1, 1, N), lambda b, i: (b, 0, 0)),               # compact bias
            ] + [resident(w) for w in weights],
            out_specs=pl.BlockSpec((1, row_tile, hidden), lambda b, i: (b, i, 0)),
            scratch_shapes=[pltpu.VMEM((row_tile, hidden), jnp.float32)],
        ),
        compiler_params=pltpu.CompilerParams(
            dimension_semantics=("parallel", "parallel"),
            vmem_limit_bytes=64 * 1024 * 1024),
    )(nodes_x, paths_x, bias_c, *weights)
    return out


def init_params(key, hidden, path_hidden, heads):
    """nn.Linear-style init; weights stored (in_features, out_features) so x @ W."""
    d = hidden // heads
    ks = jax.random.split(key, 16)

    def lin(kw, kb, fi, fo):
        bound = 1.0 / (fi ** 0.5)
        W = jax.random.uniform(kw, (fi, fo), jnp.float32, -bound, bound)
        b = jax.random.uniform(kb, (1, fo), jnp.float32, -bound, bound)
        return W, b

    Wq, bq = lin(ks[0], ks[1], hidden, hidden)
    Wk, bk = lin(ks[2], ks[3], hidden, hidden)
    Wv, bv = lin(ks[4], ks[5], hidden, hidden)
    Wsk, bsk = lin(ks[6], ks[7], path_hidden, d)
    Wsv, bsv = lin(ks[8], ks[9], path_hidden, d)
    Wo, bo = lin(ks[10], ks[11], hidden, hidden)
    return {
        "W_q": Wq, "b_q": bq, "W_k": Wk, "b_k": bk, "W_v": Wv, "b_v": bv,
        "W_sk": Wsk, "b_sk": bsk, "W_sv": Wsv, "b_sv": bsv,
        "W_o": Wo, "b_o": bo,
        "g_p": 1.0 + 0.1 * jax.random.normal(ks[12], (1, path_hidden), jnp.float32),
        "b_p": 0.1 * jax.random.normal(ks[13], (1, path_hidden), jnp.float32),
        "g_n": 1.0 + 0.1 * jax.random.normal(ks[14], (1, hidden), jnp.float32),
        "b_n": 0.1 * jax.random.normal(ks[15], (1, hidden), jnp.float32),
    }


def reference_forward(nodes, bias, paths, p, *, heads, eps=1e-5):
    """Pure-JAX reference mirroring the PyTorch forward (dropout = identity)."""
    B, N, hidden = nodes.shape
    d = hidden // heads

    q = nodes @ p["W_q"] + p["b_q"]
    k = nodes @ p["W_k"] + p["b_k"]
    v = nodes @ p["W_v"] + p["b_v"]

    def split(x):
        return x.reshape(B, N, heads, d).transpose(0, 2, 1, 3)   # (B, H, N, d)

    qh = split(q) * (d ** -0.5)
    kh = split(k)
    vh = split(v)

    mu = paths.mean(-1, keepdims=True)
    var = ((paths - mu) ** 2).mean(-1, keepdims=True)
    pn = (paths - mu) * jax.lax.rsqrt(var + eps) * p["g_p"] + p["b_p"]
    sk = pn @ p["W_sk"] + p["b_sk"]
    sv = pn @ p["W_sv"] + p["b_sv"]

    logits = (jnp.einsum('bhid,bhjd->bhij', qh, kh)
              + jnp.einsum('bhid,bijd->bhij', qh, sk)
              + jnp.broadcast_to(bias, (B, heads, N, N)))
    m = jnp.max(logits, axis=-1, keepdims=True)
    e = jnp.exp(logits - m)
    w = e / jnp.sum(e, axis=-1, keepdims=True)

    o = (jnp.einsum('bhij,bhjd->bhid', w, vh)
         + jnp.einsum('bhij,bijd->bhid', w, sv))
    o = o.transpose(0, 2, 1, 3).reshape(B, N, hidden)
    o = jnp.maximum(o @ p["W_o"] + p["b_o"], 0.0)
    y = nodes + o
    mu = y.mean(-1, keepdims=True)
    var = ((y - mu) ** 2).mean(-1, keepdims=True)
    return (y - mu) * jax.lax.rsqrt(var + eps) * p["g_n"] + p["b_n"]


def _bf16_round(x):
    # Quantize to bf16-representable f32 so the bf16-input kernel and the f32 XLA
    # reference see identical values; differences then come only from matmul precision.
    return x.astype(jnp.bfloat16).astype(jnp.float32)


if __name__ == "__main__":
    B, N = 2, 16            # batch, node/sequence length
    hidden = 64             # hidden_size
    heads = 4               # head_num  -> d = 16
    path_hidden = 32        # path_hidden_size

    key = jax.random.PRNGKey(0)
    k_nodes, k_paths, k_bias, k_params = jax.random.split(key, 4)

    nodes = _bf16_round(jax.random.normal(k_nodes, (B, N, hidden), jnp.float32))
    paths = _bf16_round(jax.random.normal(k_paths, (B, N, N, path_hidden), jnp.float32))
    # bias shaped like masking_bias output (B, 1, 1, N); random values for a stronger test.
    bias = _bf16_round(jax.random.normal(k_bias, (B, 1, 1, N), jnp.float32))

    params = init_params(k_params, hidden, path_hidden, heads)
    params = {name: _bf16_round(v) for name, v in params.items()}

    # row_tile=8 -> grid (B, 2): exercises the query-row tiling path.
    out = structure_aware_attention_forward(nodes, bias, paths, params,
                                            heads=heads, row_tile=8)
    out = jax.block_until_ready(out)

    ref = reference_forward(nodes, bias, paths, params, heads=heads)
    assert out.shape == (B, N, hidden)
    err = float(jnp.max(jnp.abs(out - ref)))
    # Tolerance covers MXU-vs-XLA matmul precision and the approx softmax reciprocal;
    # genuine semantic bugs produce O(0.1+) errors.
    assert jnp.allclose(out, ref, atol=2e-2, rtol=2e-2), err
    print("KERNEL_OK")
</pallas_src>

<mosaic_0001>
module attributes {stable_mosaic.version = 11 : i64} {
  func.func @saa_kernel(%arg0: i32, %arg1: i32, %arg2: memref<1x16x64xbf16, #tpu.memory_space<vmem>>, %arg3: memref<1x8x16x32xbf16, #tpu.memory_space<vmem>>, %arg4: memref<1x1x16xf32, #tpu.memory_space<vmem>>, %arg5: memref<64x64xf32, #tpu.memory_space<vmem>>, %arg6: memref<1x64xf32, #tpu.memory_space<vmem>>, %arg7: memref<64x128xf32, #tpu.memory_space<vmem>>, %arg8: memref<1x128xf32, #tpu.memory_space<vmem>>, %arg9: memref<1x32xf32, #tpu.memory_space<vmem>>, %arg10: memref<1x32xf32, #tpu.memory_space<vmem>>, %arg11: memref<16x32xf32, #tpu.memory_space<vmem>>, %arg12: memref<32x16xf32, #tpu.memory_space<vmem>>, %arg13: memref<1x64xf32, #tpu.memory_space<vmem>>, %arg14: memref<64x64xf32, #tpu.memory_space<vmem>>, %arg15: memref<1x64xf32, #tpu.memory_space<vmem>>, %arg16: memref<1x64xf32, #tpu.memory_space<vmem>>, %arg17: memref<1x64xf32, #tpu.memory_space<vmem>>, %arg18: memref<1x8x64xf32, #tpu.memory_space<vmem>>, %arg19: memref<8x64xf32, #tpu.memory_space<vmem>>) attributes {dimension_semantics = [#tpu.dimension_semantics<parallel>, #tpu.dimension_semantics<parallel>], iteration_bounds = array<i64: 2, 2>, scalar_prefetch = 0 : i64, scratch_operands = 1 : i64, tpu.core_type = #tpu.core_type<tc>, window_params = [{transform_indices = @transform_0, window_bounds = array<i64: 1, 16, 64>}, {transform_indices = @transform_1, window_bounds = array<i64: 1, 8, 16, 32>}, {transform_indices = @transform_2, window_bounds = array<i64: 1, 1, 16>}, {pipeline_mode = #tpu.pipeline_mode<synchronous>, transform_indices = @transform_3, window_bounds = array<i64: 64, 64>}, {pipeline_mode = #tpu.pipeline_mode<synchronous>, transform_indices = @transform_4, window_bounds = array<i64: 1, 64>}, {pipeline_mode = #tpu.pipeline_mode<synchronous>, transform_indices = @transform_5, window_bounds = array<i64: 64, 128>}, {pipeline_mode = #tpu.pipeline_mode<synchronous>, transform_indices = @transform_6, window_bounds = array<i64: 1, 128>}, {pipeline_mode = #tpu.pipeline_mode<synchronous>, transform_indices = @transform_7, window_bounds = array<i64: 1, 32>}, {pipeline_mode = #tpu.pipeline_mode<synchronous>, transform_indices = @transform_8, window_bounds = array<i64: 1, 32>}, {pipeline_mode = #tpu.pipeline_mode<synchronous>, transform_indices = @transform_9, window_bounds = array<i64: 16, 32>}, {pipeline_mode = #tpu.pipeline_mode<synchronous>, transform_indices = @transform_10, window_bounds = array<i64: 32, 16>}, {pipeline_mode = #tpu.pipeline_mode<synchronous>, transform_indices = @transform_11, window_bounds = array<i64: 1, 64>}, {pipeline_mode = #tpu.pipeline_mode<synchronous>, transform_indices = @transform_12, window_bounds = array<i64: 64, 64>}, {pipeline_mode = #tpu.pipeline_mode<synchronous>, transform_indices = @transform_13, window_bounds = array<i64: 1, 64>}, {pipeline_mode = #tpu.pipeline_mode<synchronous>, transform_indices = @transform_14, window_bounds = array<i64: 1, 64>}, {pipeline_mode = #tpu.pipeline_mode<synchronous>, transform_indices = @transform_15, window_bounds = array<i64: 1, 64>}, {transform_indices = @transform_16, window_bounds = array<i64: 1, 8, 64>}]} {
    %c8_i32 = arith.constant 8 : i32
    %0 = arith.muli %arg1, %c8_i32 : i32
    %1 = tpu.assume_multiple %0, 8 : i32
    %c0 = arith.constant 0 : index
    %c0_0 = arith.constant 0 : index
    %c0_1 = arith.constant 0 : index
    %2 = vector.load %arg2[%c0, %c0_0, %c0_1] : memref<1x16x64xbf16, #tpu.memory_space<vmem>>, vector<1x16x64xbf16>
    %3 = vector.shape_cast %2 : vector<1x16x64xbf16> to vector<16x64xbf16>
    %4 = arith.extf %3 : vector<16x64xbf16> to vector<16x64xf32>
    %c0_2 = arith.constant 0 : index
    %5 = arith.index_cast %1 : i32 to index
    %c0_3 = arith.constant 0 : index
    %6 = vector.load %arg2[%c0_2, %5, %c0_3] : memref<1x16x64xbf16, #tpu.memory_space<vmem>>, vector<1x8x64xbf16>
    %7 = vector.shape_cast %6 : vector<1x8x64xbf16> to vector<8x64xbf16>
    %8 = arith.extf %7 : vector<8x64xbf16> to vector<8x64xf32>
    %c0_4 = arith.constant 0 : index
    %c0_5 = arith.constant 0 : index
    %9 = vector.load %arg7[%c0_4, %c0_5] : memref<64x128xf32, #tpu.memory_space<vmem>>, vector<64x128xf32>
    %cst = arith.constant dense<0.000000e+00> : vector<16x128xf32>
    %10 = tpu.matmul %4, %9, %cst {dimension_numbers = #tpu.dot_dimension_numbers<[1], [0], [0], [1], [0, 0, 1, 1], [], []>} : vector<16x64xf32>, vector<64x128xf32>, vector<16x128xf32> -> vector<16x128xf32>
    %c0_6 = arith.constant 0 : index
    %c0_7 = arith.constant 0 : index
    %11 = vector.load %arg8[%c0_6, %c0_7] : memref<1x128xf32, #tpu.memory_space<vmem>>, vector<1x128xf32>
    %12 = vector.broadcast %11 : vector<1x128xf32> to vector<16x128xf32>
    %13 = arith.addf %10, %12 : vector<16x128xf32>
    %14 = vector.extract_strided_slice %13 {offsets = [0, 0], sizes = [16, 64], strides = [1, 1]} : vector<16x128xf32> to vector<16x64xf32>
    %15 = vector.extract_strided_slice %13 {offsets = [0, 64], sizes = [16, 64], strides = [1, 1]} : vector<16x128xf32> to vector<16x64xf32>
    %c0_8 = arith.constant 0 : index
    %c0_9 = arith.constant 0 : index
    %16 = vector.load %arg5[%c0_8, %c0_9] : memref<64x64xf32, #tpu.memory_space<vmem>>, vector<64x64xf32>
    %cst_10 = arith.constant dense<0.000000e+00> : vector<8x64xf32>
    %17 = tpu.matmul %8, %16, %cst_10 {dimension_numbers = #tpu.dot_dimension_numbers<[1], [0], [0], [1], [0, 0, 1, 1], [], []>} : vector<8x64xf32>, vector<64x64xf32>, vector<8x64xf32> -> vector<8x64xf32>
    %c0_11 = arith.constant 0 : index
    %c0_12 = arith.constant 0 : index
    %18 = vector.load %arg6[%c0_11, %c0_12] : memref<1x64xf32, #tpu.memory_space<vmem>>, vector<1x64xf32>
    %19 = vector.broadcast %18 : vector<1x64xf32> to vector<8x64xf32>
    %20 = arith.addf %17, %19 : vector<8x64xf32>
    %c0_13 = arith.constant 0 : index
    %c0_14 = arith.constant 0 : index
    %c0_15 = arith.constant 0 : index
    %c0_16 = arith.constant 0 : index
    %21 = vector.load %arg3[%c0_13, %c0_14, %c0_15, %c0_16] : memref<1x8x16x32xbf16, #tpu.memory_space<vmem>>, vector<1x8x16x32xbf16>
    %22 = vector.shape_cast %21 : vector<1x8x16x32xbf16> to vector<8x16x32xbf16>
    %23 = arith.extf %22 : vector<8x16x32xbf16> to vector<8x16x32xf32>
    %cst_17 = arith.constant dense<0.000000e+00> : vector<8x16xf32>
    %24 = vector.multi_reduction <add>, %23, %cst_17 [2] : vector<8x16x32xf32> to vector<8x16xf32>
    %25 = vector.shape_cast %24 : vector<8x16xf32> to vector<8x16x1xf32>
    %cst_18 = arith.constant 3.200000e+01 : f32
    %26 = vector.broadcast %cst_18 : f32 to vector<8x16x1xf32>
    %27 = arith.divf %25, %26 : vector<8x16x1xf32>
    %28 = vector.broadcast %27 : vector<8x16x1xf32> to vector<8x16x32xf32>
    %29 = arith.subf %23, %28 : vector<8x16x32xf32>
    %30 = arith.mulf %29, %29 : vector<8x16x32xf32>
    %cst_19 = arith.constant dense<0.000000e+00> : vector<8x16xf32>
    %31 = vector.multi_reduction <add>, %30, %cst_19 [2] : vector<8x16x32xf32> to vector<8x16xf32>
    %32 = vector.shape_cast %31 : vector<8x16xf32> to vector<8x16x1xf32>
    %cst_20 = arith.constant 3.200000e+01 : f32
    %33 = vector.broadcast %cst_20 : f32 to vector<8x16x1xf32>
    %34 = arith.divf %32, %33 : vector<8x16x1xf32>
    %35 = vector.broadcast %27 : vector<8x16x1xf32> to vector<8x16x32xf32>
    %36 = arith.subf %23, %35 : vector<8x16x32xf32>
    %cst_21 = arith.constant 9.99999974E-6 : f32
    %37 = vector.broadcast %cst_21 : f32 to vector<8x16x1xf32>
    %38 = arith.addf %34, %37 : vector<8x16x1xf32>
    %39 = math.rsqrt %38 : vector<8x16x1xf32>
    %40 = vector.broadcast %39 : vector<8x16x1xf32> to vector<8x16x32xf32>
    %41 = arith.mulf %36, %40 : vector<8x16x32xf32>
    %c0_22 = arith.constant 0 : index
    %c0_23 = arith.constant 0 : index
    %42 = vector.load %arg9[%c0_22, %c0_23] : memref<1x32xf32, #tpu.memory_space<vmem>>, vector<1x32xf32>
    %43 = vector.shape_cast %42 : vector<1x32xf32> to vector<1x1x32xf32>
    %44 = vector.broadcast %43 : vector<1x1x32xf32> to vector<8x16x32xf32>
    %45 = arith.mulf %41, %44 : vector<8x16x32xf32>
    %c0_24 = arith.constant 0 : index
    %c0_25 = arith.constant 0 : index
    %46 = vector.load %arg10[%c0_24, %c0_25] : memref<1x32xf32, #tpu.memory_space<vmem>>, vector<1x32xf32>
    %47 = vector.shape_cast %46 : vector<1x32xf32> to vector<1x1x32xf32>
    %48 = vector.broadcast %47 : vector<1x1x32xf32> to vector<8x16x32xf32>
    %49 = arith.addf %45, %48 : vector<8x16x32xf32>
    %50 = vector.extract_strided_slice %20 {offsets = [0, 0], sizes = [8, 16], strides = [1, 1]} : vector<8x64xf32> to vector<8x16xf32>
    %51 = vector.extract_strided_slice %20 {offsets = [0, 16], sizes = [8, 16], strides = [1, 1]} : vector<8x64xf32> to vector<8x16xf32>
    %52 = vector.extract_strided_slice %20 {offsets = [0, 32], sizes = [8, 16], strides = [1, 1]} : vector<8x64xf32> to vector<8x16xf32>
    %53 = vector.extract_strided_slice %20 {offsets = [0, 48], sizes = [8, 16], strides = [1, 1]} : vector<8x64xf32> to vector<8x16xf32>
    %54 = vector.shape_cast %50 : vector<8x16xf32> to vector<1x8x16xf32>
    %55 = vector.shape_cast %51 : vector<8x16xf32> to vector<1x8x16xf32>
    %56 = vector.shape_cast %52 : vector<8x16xf32> to vector<1x8x16xf32>
    %57 = vector.shape_cast %53 : vector<8x16xf32> to vector<1x8x16xf32>
    %58 = tpu.concatenate %54, %55, %56, %57 in 0 : vector<1x8x16xf32>, vector<1x8x16xf32>, vector<1x8x16xf32>, vector<1x8x16xf32> -> vector<4x8x16xf32>
    %59 = vector.extract_strided_slice %14 {offsets = [0, 0], sizes = [16, 16], strides = [1, 1]} : vector<16x64xf32> to vector<16x16xf32>
    %60 = vector.extract_strided_slice %14 {offsets = [0, 16], sizes = [16, 16], strides = [1, 1]} : vector<16x64xf32> to vector<16x16xf32>
    %61 = vector.extract_strided_slice %14 {offsets = [0, 32], sizes = [16, 16], strides = [1, 1]} : vector<16x64xf32> to vector<16x16xf32>
    %62 = vector.extract_strided_slice %14 {offsets = [0, 48], sizes = [16, 16], strides = [1, 1]} : vector<16x64xf32> to vector<16x16xf32>
    %63 = vector.shape_cast %59 : vector<16x16xf32> to vector<1x16x16xf32>
    %64 = vector.shape_cast %60 : vector<16x16xf32> to vector<1x16x16xf32>
    %65 = vector.shape_cast %61 : vector<16x16xf32> to vector<1x16x16xf32>
    %66 = vector.shape_cast %62 : vector<16x16xf32> to vector<1x16x16xf32>
    %67 = tpu.concatenate %63, %64, %65, %66 in 0 : vector<1x16x16xf32>, vector<1x16x16xf32>, vector<1x16x16xf32>, vector<1x16x16xf32> -> vector<4x16x16xf32>
    %68 = vector.extract_strided_slice %15 {offsets = [0, 0], sizes = [16, 16], strides = [1, 1]} : vector<16x64xf32> to vector<16x16xf32>
    %69 = vector.extract_strided_slice %15 {offsets = [0, 16], sizes = [16, 16], strides = [1, 1]} : vector<16x64xf32> to vector<16x16xf32>
    %70 = vector.extract_strided_slice %15 {offsets = [0, 32], sizes = [16, 16], strides = [1, 1]} : vector<16x64xf32> to vector<16x16xf32>
    %71 = vector.extract_strided_slice %15 {offsets = [0, 48], sizes = [16, 16], strides = [1, 1]} : vector<16x64xf32> to vector<16x16xf32>
    %72 = vector.shape_cast %68 : vector<16x16xf32> to vector<1x16x16xf32>
    %73 = vector.shape_cast %69 : vector<16x16xf32> to vector<1x16x16xf32>
    %74 = vector.shape_cast %70 : vector<16x16xf32> to vector<1x16x16xf32>
    %75 = vector.shape_cast %71 : vector<16x16xf32> to vector<1x16x16xf32>
    %76 = tpu.concatenate %72, %73, %74, %75 in 0 : vector<1x16x16xf32>, vector<1x16x16xf32>, vector<1x16x16xf32>, vector<1x16x16xf32> -> vector<4x16x16xf32>
    "tpu.trace_start"() <{level = 10 : i32, message = "htd,hnd->htn"}> : () -> ()
    %cst_26 = arith.constant dense<0.000000e+00> : vector<4x8x16xf32>
    %77 = tpu.matmul %58, %67, %cst_26 {dimension_numbers = #tpu.dot_dimension_numbers<[2], [2], [1], [1], [0, 0, 0, 1, 1, 1], [0], [0]>} : vector<4x8x16xf32>, vector<4x16x16xf32>, vector<4x8x16xf32> -> vector<4x8x16xf32>
    "tpu.trace_stop"() : () -> ()
    %78 = vector.extract_strided_slice %20 {offsets = [0, 0], sizes = [8, 16], strides = [1, 1]} : vector<8x64xf32> to vector<8x16xf32>
    %c0_27 = arith.constant 0 : index
    %c0_28 = arith.constant 0 : index
    %79 = vector.load %arg11[%c0_27, %c0_28] : memref<16x32xf32, #tpu.memory_space<vmem>>, vector<16x32xf32>
    %cst_29 = arith.constant dense<0.000000e+00> : vector<8x32xf32>
    %80 = tpu.matmul %78, %79, %cst_29 {dimension_numbers = #tpu.dot_dimension_numbers<[1], [0], [0], [1], [0, 0, 1, 1], [], []>} : vector<8x16xf32>, vector<16x32xf32>, vector<8x32xf32> -> vector<8x32xf32>
    %81 = vector.extract_strided_slice %20 {offsets = [0, 16], sizes = [8, 16], strides = [1, 1]} : vector<8x64xf32> to vector<8x16xf32>
    %c0_30 = arith.constant 0 : index
    %c0_31 = arith.constant 0 : index
    %82 = vector.load %arg11[%c0_30, %c0_31] : memref<16x32xf32, #tpu.memory_space<vmem>>, vector<16x32xf32>
    %cst_32 = arith.constant dense<0.000000e+00> : vector<8x32xf32>
    %83 = tpu.matmul %81, %82, %cst_32 {dimension_numbers = #tpu.dot_dimension_numbers<[1], [0], [0], [1], [0, 0, 1, 1], [], []>} : vector<8x16xf32>, vector<16x32xf32>, vector<8x32xf32> -> vector<8x32xf32>
    %84 = vector.extract_strided_slice %20 {offsets = [0, 32], sizes = [8, 16], strides = [1, 1]} : vector<8x64xf32> to vector<8x16xf32>
    %c0_33 = arith.constant 0 : index
    %c0_34 = arith.constant 0 : index
    %85 = vector.load %arg11[%c0_33, %c0_34] : memref<16x32xf32, #tpu.memory_space<vmem>>, vector<16x32xf32>
    %cst_35 = arith.constant dense<0.000000e+00> : vector<8x32xf32>
    %86 = tpu.matmul %84, %85, %cst_35 {dimension_numbers = #tpu.dot_dimension_numbers<[1], [0], [0], [1], [0, 0, 1, 1], [], []>} : vector<8x16xf32>, vector<16x32xf32>, vector<8x32xf32> -> vector<8x32xf32>
    %87 = vector.extract_strided_slice %20 {offsets = [0, 48], sizes = [8, 16], strides = [1, 1]} : vector<8x64xf32> to vector<8x16xf32>
    %c0_36 = arith.constant 0 : index
    %c0_37 = arith.constant 0 : index
    %88 = vector.load %arg11[%c0_36, %c0_37] : memref<16x32xf32, #tpu.memory_space<vmem>>, vector<16x32xf32>
    %cst_38 = arith.constant dense<0.000000e+00> : vector<8x32xf32>
    %89 = tpu.matmul %87, %88, %cst_38 {dimension_numbers = #tpu.dot_dimension_numbers<[1], [0], [0], [1], [0, 0, 1, 1], [], []>} : vector<8x16xf32>, vector<16x32xf32>, vector<8x32xf32> -> vector<8x32xf32>
    %90 = vector.shape_cast %80 : vector<8x32xf32> to vector<1x8x32xf32>
    %91 = vector.shape_cast %83 : vector<8x32xf32> to vector<1x8x32xf32>
    %92 = vector.shape_cast %86 : vector<8x32xf32> to vector<1x8x32xf32>
    %93 = vector.shape_cast %89 : vector<8x32xf32> to vector<1x8x32xf32>
    %94 = tpu.concatenate %90, %91, %92, %93 in 0 : vector<1x8x32xf32>, vector<1x8x32xf32>, vector<1x8x32xf32>, vector<1x8x32xf32> -> vector<4x8x32xf32>
    %95 = tpu.transpose %94, [1, 0, 2] : vector<4x8x32xf32> -> vector<8x4x32xf32>
    "tpu.trace_start"() <{level = 10 : i32, message = "thp,tnp->thn"}> : () -> ()
    %cst_39 = arith.constant dense<0.000000e+00> : vector<8x4x16xf32>
    %96 = tpu.matmul %95, %49, %cst_39 {dimension_numbers = #tpu.dot_dimension_numbers<[2], [2], [1], [1], [0, 0, 0, 1, 1, 1], [0], [0]>} : vector<8x4x32xf32>, vector<8x16x32xf32>, vector<8x4x16xf32> -> vector<8x4x16xf32>
    "tpu.trace_stop"() : () -> ()
    %97 = tpu.transpose %96, [1, 0, 2] : vector<8x4x16xf32> -> vector<4x8x16xf32>
    %98 = arith.addf %77, %97 : vector<4x8x16xf32>
    %c0_40 = arith.constant 0 : index
    %c0_41 = arith.constant 0 : index
    %c0_42 = arith.constant 0 : index
    %99 = vector.load %arg4[%c0_40, %c0_41, %c0_42] : memref<1x1x16xf32, #tpu.memory_space<vmem>>, vector<1x1x16xf32>
    %100 = vector.broadcast %99 : vector<1x1x16xf32> to vector<4x8x16xf32>
    %101 = arith.addf %98, %100 : vector<4x8x16xf32>
    %cst_43 = arith.constant dense<0xFF800000> : vector<4x8xf32>
    %102 = vector.multi_reduction <maximumf>, %101, %cst_43 [2] : vector<4x8x16xf32> to vector<4x8xf32>
    %103 = vector.shape_cast %102 : vector<4x8xf32> to vector<4x8x1xf32>
    %104 = vector.broadcast %103 : vector<4x8x1xf32> to vector<4x8x16xf32>
    %105 = arith.subf %101, %104 : vector<4x8x16xf32>
    %106 = math.exp %105 : vector<4x8x16xf32>
    %cst_44 = arith.constant dense<0.000000e+00> : vector<4x8xf32>
    %107 = vector.multi_reduction <add>, %106, %cst_44 [2] : vector<4x8x16xf32> to vector<4x8xf32>
    %108 = vector.shape_cast %107 : vector<4x8xf32> to vector<4x8x1xf32>
    %109 = tpu.reciprocal %108 {approx = true} : vector<4x8x1xf32> -> vector<4x8x1xf32>
    %110 = vector.broadcast %109 : vector<4x8x1xf32> to vector<4x8x16xf32>
    %111 = arith.mulf %106, %110 : vector<4x8x16xf32>
    "tpu.trace_start"() <{level = 10 : i32, message = "htn,hnd->htd"}> : () -> ()
    %cst_45 = arith.constant dense<0.000000e+00> : vector<4x8x16xf32>
    %112 = tpu.matmul %111, %76, %cst_45 {dimension_numbers = #tpu.dot_dimension_numbers<[2], [1], [1], [2], [0, 0, 0, 1, 1, 2], [0], [0]>} : vector<4x8x16xf32>, vector<4x16x16xf32>, vector<4x8x16xf32> -> vector<4x8x16xf32>
    "tpu.trace_stop"() : () -> ()
    %113 = tpu.transpose %111, [1, 0, 2] : vector<4x8x16xf32> -> vector<8x4x16xf32>
    "tpu.trace_start"() <{level = 10 : i32, message = "thn,tnp->thp"}> : () -> ()
    %cst_46 = arith.constant dense<0.000000e+00> : vector<8x4x32xf32>
    %114 = tpu.matmul %113, %49, %cst_46 {dimension_numbers = #tpu.dot_dimension_numbers<[2], [1], [1], [2], [0, 0, 0, 1, 1, 2], [0], [0]>} : vector<8x4x16xf32>, vector<8x16x32xf32>, vector<8x4x32xf32> -> vector<8x4x32xf32>
    "tpu.trace_stop"() : () -> ()
    %115 = tpu.transpose %114, [1, 0, 2] : vector<8x4x32xf32> -> vector<4x8x32xf32>
    %116 = vector.extract_strided_slice %112 {offsets = [0, 0, 0], sizes = [1, 8, 16], strides = [1, 1, 1]} : vector<4x8x16xf32> to vector<1x8x16xf32>
    %117 = vector.shape_cast %116 : vector<1x8x16xf32> to vector<8x16xf32>
    %118 = vector.extract_strided_slice %115 {offsets = [0, 0, 0], sizes = [1, 8, 32], strides = [1, 1, 1]} : vector<4x8x32xf32> to vector<1x8x32xf32>
    %119 = vector.shape_cast %118 : vector<1x8x32xf32> to vector<8x32xf32>
    %c0_47 = arith.constant 0 : index
    %c0_48 = arith.constant 0 : index
    %120 = vector.load %arg12[%c0_47, %c0_48] : memref<32x16xf32, #tpu.memory_space<vmem>>, vector<32x16xf32>
    %cst_49 = arith.constant dense<0.000000e+00> : vector<8x16xf32>
    %121 = tpu.matmul %119, %120, %cst_49 {dimension_numbers = #tpu.dot_dimension_numbers<[1], [0], [0], [1], [0, 0, 1, 1], [], []>} : vector<8x32xf32>, vector<32x16xf32>, vector<8x16xf32> -> vector<8x16xf32>
    %122 = arith.addf %117, %121 : vector<8x16xf32>
    %c0_50 = arith.constant 0 : index
    %c0_51 = arith.constant 0 : index
    %123 = vector.load %arg19[%c0_50, %c0_51] : memref<8x64xf32, #tpu.memory_space<vmem>>, vector<8x16xf32>
    tpu.vector_store %arg19[%c0_50, %c0_51], %122 {strides = array<i32>} : memref<8x64xf32, #tpu.memory_space<vmem>>, vector<8x16xf32>,
    %124 = vector.extract_strided_slice %112 {offsets = [1, 0, 0], sizes = [1, 8, 16], strides = [1, 1, 1]} : vector<4x8x16xf32> to vector<1x8x16xf32>
    %125 = vector.shape_cast %124 : vector<1x8x16xf32> to vector<8x16xf32>
    %126 = vector.extract_strided_slice %115 {offsets = [1, 0, 0], sizes = [1, 8, 32], strides = [1, 1, 1]} : vector<4x8x32xf32> to vector<1x8x32xf32>
    %127 = vector.shape_cast %126 : vector<1x8x32xf32> to vector<8x32xf32>
    %c0_52 = arith.constant 0 : index
    %c0_53 = arith.constant 0 : index
    %128 = vector.load %arg12[%c0_52, %c0_53] : memref<32x16xf32, #tpu.memory_space<vmem>>, vector<32x16xf32>
    %cst_54 = arith.constant dense<0.000000e+00> : vector<8x16xf32>
    %129 = tpu.matmul %127, %128, %cst_54 {dimension_numbers = #tpu.dot_dimension_numbers<[1], [0], [0], [1], [0, 0, 1, 1], [], []>} : vector<8x32xf32>, vector<32x16xf32>, vector<8x16xf32> -> vector<8x16xf32>
    %130 = arith.addf %125, %129 : vector<8x16xf32>
    %c0_55 = arith.constant 0 : index
    %c16 = arith.constant 16 : index
    %131 = vector.load %arg19[%c0_55, %c16] : memref<8x64xf32, #tpu.memory_space<vmem>>, vector<8x16xf32>
    tpu.vector_store %arg19[%c0_55, %c16], %130 {strides = array<i32>} : memref<8x64xf32, #tpu.memory_space<vmem>>, vector<8x16xf32>,
    %132 = vector.extract_strided_slice %112 {offsets = [2, 0, 0], sizes = [1, 8, 16], strides = [1, 1, 1]} : vector<4x8x16xf32> to vector<1x8x16xf32>
    %133 = vector.shape_cast %132 : vector<1x8x16xf32> to vector<8x16xf32>
    %134 = vector.extract_strided_slice %115 {offsets = [2, 0, 0], sizes = [1, 8, 32], strides = [1, 1, 1]} : vector<4x8x32xf32> to vector<1x8x32xf32>
    %135 = vector.shape_cast %134 : vector<1x8x32xf32> to vector<8x32xf32>
    %c0_56 = arith.constant 0 : index
    %c0_57 = arith.constant 0 : index
    %136 = vector.load %arg12[%c0_56, %c0_57] : memref<32x16xf32, #tpu.memory_space<vmem>>, vector<32x16xf32>
    %cst_58 = arith.constant dense<0.000000e+00> : vector<8x16xf32>
    %137 = tpu.matmul %135, %136, %cst_58 {dimension_numbers = #tpu.dot_dimension_numbers<[1], [0], [0], [1], [0, 0, 1, 1], [], []>} : vector<8x32xf32>, vector<32x16xf32>, vector<8x16xf32> -> vector<8x16xf32>
    %138 = arith.addf %133, %137 : vector<8x16xf32>
    %c0_59 = arith.constant 0 : index
    %c32 = arith.constant 32 : index
    %139 = vector.load %arg19[%c0_59, %c32] : memref<8x64xf32, #tpu.memory_space<vmem>>, vector<8x16xf32>
    tpu.vector_store %arg19[%c0_59, %c32], %138 {strides = array<i32>} : memref<8x64xf32, #tpu.memory_space<vmem>>, vector<8x16xf32>,
    %140 = vector.extract_strided_slice %112 {offsets = [3, 0, 0], sizes = [1, 8, 16], strides = [1, 1, 1]} : vector<4x8x16xf32> to vector<1x8x16xf32>
    %141 = vector.shape_cast %140 : vector<1x8x16xf32> to vector<8x16xf32>
    %142 = vector.extract_strided_slice %115 {offsets = [3, 0, 0], sizes = [1, 8, 32], strides = [1, 1, 1]} : vector<4x8x32xf32> to vector<1x8x32xf32>
    %143 = vector.shape_cast %142 : vector<1x8x32xf32> to vector<8x32xf32>
    %c0_60 = arith.constant 0 : index
    %c0_61 = arith.constant 0 : index
    %144 = vector.load %arg12[%c0_60, %c0_61] : memref<32x16xf32, #tpu.memory_space<vmem>>, vector<32x16xf32>
    %cst_62 = arith.constant dense<0.000000e+00> : vector<8x16xf32>
    %145 = tpu.matmul %143, %144, %cst_62 {dimension_numbers = #tpu.dot_dimension_numbers<[1], [0], [0], [1], [0, 0, 1, 1], [], []>} : vector<8x32xf32>, vector<32x16xf32>, vector<8x16xf32> -> vector<8x16xf32>
    %146 = arith.addf %141, %145 : vector<8x16xf32>
    %c0_63 = arith.constant 0 : index
    %c48 = arith.constant 48 : index
    %147 = vector.load %arg19[%c0_63, %c48] : memref<8x64xf32, #tpu.memory_space<vmem>>, vector<8x16xf32>
    tpu.vector_store %arg19[%c0_63, %c48], %146 {strides = array<i32>} : memref<8x64xf32, #tpu.memory_space<vmem>>, vector<8x16xf32>,
    %c0_64 = arith.constant 0 : index
    %c0_65 = arith.constant 0 : index
    %148 = vector.load %arg19[%c0_64, %c0_65] : memref<8x64xf32, #tpu.memory_space<vmem>>, vector<8x64xf32>
    %c0_66 = arith.constant 0 : index
    %c0_67 = arith.constant 0 : index
    %149 = vector.load %arg13[%c0_66, %c0_67] : memref<1x64xf32, #tpu.memory_space<vmem>>, vector<1x64xf32>
    %150 = vector.broadcast %149 : vector<1x64xf32> to vector<8x64xf32>
    %151 = arith.addf %148, %150 : vector<8x64xf32>
    %c0_68 = arith.constant 0 : index
    %c0_69 = arith.constant 0 : index
    %152 = vector.load %arg14[%c0_68, %c0_69] : memref<64x64xf32, #tpu.memory_space<vmem>>, vector<64x64xf32>
    %cst_70 = arith.constant dense<0.000000e+00> : vector<8x64xf32>
    %153 = tpu.matmul %151, %152, %cst_70 {dimension_numbers = #tpu.dot_dimension_numbers<[1], [0], [0], [1], [0, 0, 1, 1], [], []>} : vector<8x64xf32>, vector<64x64xf32>, vector<8x64xf32> -> vector<8x64xf32>
    %c0_71 = arith.constant 0 : index
    %c0_72 = arith.constant 0 : index
    %154 = vector.load %arg15[%c0_71, %c0_72] : memref<1x64xf32, #tpu.memory_space<vmem>>, vector<1x64xf32>
    %155 = vector.broadcast %154 : vector<1x64xf32> to vector<8x64xf32>
    %156 = arith.addf %153, %155 : vector<8x64xf32>
    %cst_73 = arith.constant 0.000000e+00 : f32
    %157 = vector.broadcast %cst_73 : f32 to vector<8x64xf32>
    %158 = arith.maximumf %156, %157 : vector<8x64xf32>
    %159 = arith.addf %8, %158 : vector<8x64xf32>
    %cst_74 = arith.constant dense<0.000000e+00> : vector<8xf32>
    %160 = vector.multi_reduction <add>, %159, %cst_74 [1] : vector<8x64xf32> to vector<8xf32>
    %161 = vector.shape_cast %160 : vector<8xf32> to vector<8x1xf32>
    %cst_75 = arith.constant 6.400000e+01 : f32
    %162 = vector.broadcast %cst_75 : f32 to vector<8x1xf32>
    %163 = arith.divf %161, %162 : vector<8x1xf32>
    %164 = vector.broadcast %163 : vector<8x1xf32> to vector<8x64xf32>
    %165 = arith.subf %159, %164 : vector<8x64xf32>
    %166 = arith.mulf %165, %165 : vector<8x64xf32>
    %cst_76 = arith.constant dense<0.000000e+00> : vector<8xf32>
    %167 = vector.multi_reduction <add>, %166, %cst_76 [1] : vector<8x64xf32> to vector<8xf32>
    %168 = vector.shape_cast %167 : vector<8xf32> to vector<8x1xf32>
    %cst_77 = arith.constant 6.400000e+01 : f32
    %169 = vector.broadcast %cst_77 : f32 to vector<8x1xf32>
    %170 = arith.divf %168, %169 : vector<8x1xf32>
    %171 = vector.broadcast %163 : vector<8x1xf32> to vector<8x64xf32>
    %172 = arith.subf %159, %171 : vector<8x64xf32>
    %cst_78 = arith.constant 9.99999974E-6 : f32
    %173 = vector.broadcast %cst_78 : f32 to vector<8x1xf32>
    %174 = arith.addf %170, %173 : vector<8x1xf32>
    %175 = math.rsqrt %174 : vector<8x1xf32>
    %176 = vector.broadcast %175 : vector<8x1xf32> to vector<8x64xf32>
    %177 = arith.mulf %172, %176 : vector<8x64xf32>
    %c0_79 = arith.constant 0 : index
    %c0_80 = arith.constant 0 : index
    %178 = vector.load %arg16[%c0_79, %c0_80] : memref<1x64xf32, #tpu.memory_space<vmem>>, vector<1x64xf32>
    %179 = vector.broadcast %178 : vector<1x64xf32> to vector<8x64xf32>
    %180 = arith.mulf %177, %179 : vector<8x64xf32>
    %c0_81 = arith.constant 0 : index
    %c0_82 = arith.constant 0 : index
    %181 = vector.load %arg17[%c0_81, %c0_82] : memref<1x64xf32, #tpu.memory_space<vmem>>, vector<1x64xf32>
    %182 = vector.broadcast %181 : vector<1x64xf32> to vector<8x64xf32>
    %183 = arith.addf %180, %182 : vector<8x64xf32>
    %c0_83 = arith.constant 0 : index
    %c0_84 = arith.constant 0 : index
    %c0_85 = arith.constant 0 : index
    %184 = vector.load %arg18[%c0_83, %c0_84, %c0_85] : memref<1x8x64xf32, #tpu.memory_space<vmem>>, vector<1x8x64xf32>
    %185 = vector.shape_cast %184 : vector<1x8x64xf32> to vector<8x64xf32>
    %186 = vector.shape_cast %183 : vector<8x64xf32> to vector<1x8x64xf32>
    tpu.vector_store %arg18[%c0_83, %c0_84, %c0_85], %186 {strides = array<i32>} : memref<1x8x64xf32, #tpu.memory_space<vmem>>, vector<1x8x64xf32>,
    return
  }
  func.func @transform_0(%arg0: i32, %arg1: i32) -> (i32, i32, i32) {
    %c0_i32 = arith.constant 0 : i32
    %c0_i32_0 = arith.constant 0 : i32
    %c0_i32_1 = arith.constant 0 : i32
    return %arg0, %c0_i32, %c0_i32_0 : i32, i32, i32
  }
  func.func @transform_1(%arg0: i32, %arg1: i32) -> (i32, i32, i32, i32) {
    %c0_i32 = arith.constant 0 : i32
    %c0_i32_0 = arith.constant 0 : i32
    %c0_i32_1 = arith.constant 0 : i32
    return %arg0, %arg1, %c0_i32, %c0_i32_0 : i32, i32, i32, i32
  }
  func.func @transform_2(%arg0: i32, %arg1: i32) -> (i32, i32, i32) {
    %c0_i32 = arith.constant 0 : i32
    %c0_i32_0 = arith.constant 0 : i32
    %c0_i32_1 = arith.constant 0 : i32
    return %arg0, %c0_i32, %c0_i32_0 : i32, i32, i32
  }
  func.func @transform_3(%arg0: i32, %arg1: i32) -> (i32, i32) {
    %c0_i32 = arith.constant 0 : i32
    %c0_i32_0 = arith.constant 0 : i32
    %c0_i32_1 = arith.constant 0 : i32
    return %c0_i32, %c0_i32_0 : i32, i32
  }
  func.func @transform_4(%arg0: i32, %arg1: i32) -> (i32, i32) {
    %c0_i32 = arith.constant 0 : i32
    %c0_i32_0 = arith.constant 0 : i32
    %c0_i32_1 = arith.constant 0 : i32
    return %c0_i32, %c0_i32_0 : i32, i32
  }
  func.func @transform_5(%arg0: i32, %arg1: i32) -> (i32, i32) {
    %c0_i32 = arith.constant 0 : i32
    %c0_i32_0 = arith.constant 0 : i32
    %c0_i32_1 = arith.constant 0 : i32
    return %c0_i32, %c0_i32_0 : i32, i32
  }
  func.func @transform_6(%arg0: i32, %arg1: i32) -> (i32, i32) {
    %c0_i32 = arith.constant 0 : i32
    %c0_i32_0 = arith.constant 0 : i32
    %c0_i32_1 = arith.constant 0 : i32
    return %c0_i32, %c0_i32_0 : i32, i32
  }
  func.func @transform_7(%arg0: i32, %arg1: i32) -> (i32, i32) {
    %c0_i32 = arith.constant 0 : i32
    %c0_i32_0 = arith.constant 0 : i32
    %c0_i32_1 = arith.constant 0 : i32
    return %c0_i32, %c0_i32_0 : i32, i32
  }
  func.func @transform_8(%arg0: i32, %arg1: i32) -> (i32, i32) {
    %c0_i32 = arith.constant 0 : i32
    %c0_i32_0 = arith.constant 0 : i32
    %c0_i32_1 = arith.constant 0 : i32
    return %c0_i32, %c0_i32_0 : i32, i32
  }
  func.func @transform_9(%arg0: i32, %arg1: i32) -> (i32, i32) {
    %c0_i32 = arith.constant 0 : i32
    %c0_i32_0 = arith.constant 0 : i32
    %c0_i32_1 = arith.constant 0 : i32
    return %c0_i32, %c0_i32_0 : i32, i32
  }
  func.func @transform_10(%arg0: i32, %arg1: i32) -> (i32, i32) {
    %c0_i32 = arith.constant 0 : i32
    %c0_i32_0 = arith.constant 0 : i32
    %c0_i32_1 = arith.constant 0 : i32
    return %c0_i32, %c0_i32_0 : i32, i32
  }
  func.func @transform_11(%arg0: i32, %arg1: i32) -> (i32, i32) {
    %c0_i32 = arith.constant 0 : i32
    %c0_i32_0 = arith.constant 0 : i32
    %c0_i32_1 = arith.constant 0 : i32
    return %c0_i32, %c0_i32_0 : i32, i32
  }
  func.func @transform_12(%arg0: i32, %arg1: i32) -> (i32, i32) {
    %c0_i32 = arith.constant 0 : i32
    %c0_i32_0 = arith.constant 0 : i32
    %c0_i32_1 = arith.constant 0 : i32
    return %c0_i32, %c0_i32_0 : i32, i32
  }
  func.func @transform_13(%arg0: i32, %arg1: i32) -> (i32, i32) {
    %c0_i32 = arith.constant 0 : i32
    %c0_i32_0 = arith.constant 0 : i32
    %c0_i32_1 = arith.constant 0 : i32
    return %c0_i32, %c0_i32_0 : i32, i32
  }
  func.func @transform_14(%arg0: i32, %arg1: i32) -> (i32, i32) {
    %c0_i32 = arith.constant 0 : i32
    %c0_i32_0 = arith.constant 0 : i32
    %c0_i32_1 = arith.constant 0 : i32
    return %c0_i32, %c0_i32_0 : i32, i32
  }
  func.func @transform_15(%arg0: i32, %arg1: i32) -> (i32, i32) {
    %c0_i32 = arith.constant 0 : i32
    %c0_i32_0 = arith.constant 0 : i32
    %c0_i32_1 = arith.constant 0 : i32
    return %c0_i32, %c0_i32_0 : i32, i32
  }
  func.func @transform_16(%arg0: i32, %arg1: i32) -> (i32, i32, i32) {
    %c0_i32 = arith.constant 0 : i32
    %c0_i32_0 = arith.constant 0 : i32
    return %arg0, %arg1, %c0_i32 : i32, i32, i32
  }
}

</mosaic_0001>

<bundles_post_ra>
// kernel: tpu_custom_call.1
= control target key start
LH: loop header
LB: loop body
LE: loop exit
PB: predicated region body
PF: predicated region fallthrough
CT: control target
= control target key end

     0   :  { %s7626_s0 = inlined_call_operand.hbm [shape: bf16[2,16,64], index: 0, kind: input, shape index: {}]   ;;  %s7627_s1 = inlined_call_operand.hbm [shape: bf16[2,16,16,32], index: 1, kind: input, shape index: {}]   ;;  %s7628_s2 = inlined_call_operand.hbm [shape: f32[2,1,16], index: 2, kind: input, shape index: {}]   ;;  %s7629_s3 = inlined_call_operand.hbm [shape: f32[64,64], index: 3, kind: input, shape index: {}]   ;;  %s7630_s4 = inlined_call_operand.hbm [shape: f32[1,64], index: 4, kind: input, shape index: {}]   ;;  %s7631_s5 = inlined_call_operand.hbm [shape: f32[64,128], index: 5, kind: input, shape index: {}]   ;;  %s7632_s6 = inlined_call_operand.hbm [shape: f32[1,128], index: 6, kind: input, shape index: {}]   ;;  %s7633_s7 = inlined_call_operand.hbm [shape: f32[1,32], index: 7, kind: input, shape index: {}]   ;;  %s7634_s8 = inlined_call_operand.hbm [shape: f32[1,32], index: 8, kind: input, shape index: {}]   ;;  %s7635_s9 = inlined_call_operand.hbm [shape: f32[16,32], index: 9, kind: input, shape index: {}]   ;;  %s7636_s10 = inlined_call_operand.hbm [shape: f32[32,16], index: 10, kind: input, shape index: {}]   ;;  %s7637_s11 = inlined_call_operand.hbm [shape: f32[1,64], index: 11, kind: input, shape index: {}]   ;;  %s7638_s12 = inlined_call_operand.hbm [shape: f32[64,64], index: 12, kind: input, shape index: {}]   ;;  %s7639_s13 = inlined_call_operand.hbm [shape: f32[1,64], index: 13, kind: input, shape index: {}]   ;;  %s7640_s14 = inlined_call_operand.hbm [shape: f32[1,64], index: 14, kind: input, shape index: {}]   ;;  %s7641_s15 = inlined_call_operand.hbm [shape: f32[1,64], index: 15, kind: input, shape index: {}]   ;;  %s7642_s16 = inlined_call_operand.hbm [shape: f32[2,16,64], index: 16, kind: output, shape index: {}]  }
   0x1   :  { %7681 = sst [smem:[#allocation51_spill]] %s7626_s0 }
   0x2   :  { %7682 = sst [smem:[#allocation52_spill]] %s7627_s1 }
   0x3   :  { %7683 = sst [smem:[#allocation53_spill]] %s7628_s2 }
   0x4   :  { %7684 = sst [smem:[#allocation54_spill]] %s7629_s3 }
   0x5   :  { %7685 = sst [smem:[#allocation55_spill]] %s7630_s4 }
   0x6   :  { %7686 = sst [smem:[#allocation56_spill]] %s7631_s5 }
   0x7   :  { %7687 = sst [smem:[#allocation57_spill]] %s7632_s6 }
   0x8   :  { %7688 = sst [smem:[#allocation58_spill]] %s7633_s7 }
   0x9   :  { %7689 = sst [smem:[#allocation59_spill]] %s7634_s8 }
   0xa   :  { %7690 = sst [smem:[#allocation60_spill]] %s7635_s9 }
   0xb   :  { %7691 = sst [smem:[#allocation61_spill]] %s7636_s10 }
   0xc   :  { %7692 = sst [smem:[#allocation62_spill]] %s7637_s11 }
   0xd   :  { %7693 = sst [smem:[#allocation63_spill]] %s7638_s12 }
   0xe   :  { %7694 = sst [smem:[#allocation64_spill]] %s7639_s13 }
   0xf   :  { %7695 = sst [smem:[#allocation65_spill]] %s7640_s14 }
  0x10   :  { %7696 = sst [smem:[#allocation66_spill]] %s7641_s15 }
  0x11   :  { %7697 = sst [smem:[#allocation67_spill]] %s7642_s16 }
  0x12   :  { %21 = vsyncpa [#allocation4], 0 }
  0x13   :  { %23 = vsyncpa [#allocation4 + $0x1], 0 }
  0x14   :  { %24 = vsyncpa [#allocation7], 0 }
  0x15   :  { %26 = vsyncpa [#allocation7 + $0x1], 0 }
  0x16   :  { %27 = vsyncpa [#allocation10], 0 }
  0x17   :  { %28 = vsyncpa [#allocation13], 0 }
  0x18   :  { %29 = vsyncpa [#allocation16], 0 }
  0x19   :  { %30 = vsyncpa [#allocation19], 0 }
  0x1a   :  { %31 = vsyncpa [#allocation22], 0 }
  0x1b   :  { %32 = vsyncpa [#allocation25], 0 }
  0x1c   :  { %33 = vsyncpa [#allocation28], 0 }
  0x1d   :  { %34 = vsyncpa [#allocation5], 0 }
  0x1e   :  { %36 = vsyncpa [#allocation5 + $0x1], 0  ;;  %s6321_s21 = smov 0   ;;  %s6323_s22 = smov 0  }
  0x1f   :  { %s6325_s23 = smov 0   ;;  %s6327_s24 = smov 0  }
  0x20   :  { %s6329_s25 = smov 0   ;;  %s6331_s26 = smov 0  }
  0x21   :  { %s6333_s27 = smov 0   ;;  %s6335_s28 = smov 0  }
  0x22   :  { %s6337_s29 = smov 0   ;;  %s6339_s30 = smov 0  }
  0x23   :  { %s6341_s0 = smov 0  }
  0x24 LB: > { %7698 = sst [smem:[#allocation41_spill]] %s6173_s24  ;;  %s6377_s17 = sadd.s32 4294967295, %s6201_s0   ;;  %s6201_s0 = sphi %s6341_s0, %s42_s0   ;;  %s6197_s30 = sphi %s6339_s30, %s7790_s30   ;;  %s6193_s29 = sphi %s6337_s29, %s7783_s29   ;;  %s6189_s28 = sphi %s6335_s28, %s7789_s28   ;;  %s6185_s27 = sphi %s6333_s27, %s7782_s27   ;;  %s6181_s26 = sphi %s6331_s26, %s7788_s26   ;;  %s6177_s25 = sphi %s6329_s25, %s7781_s25   ;;  %s6173_s24 = sphi %s6327_s24, %s7780_s24   ;;  %s6169_s23 = sphi %s6325_s23, %s7787_s23   ;;  %s6165_s22 = sphi %s6323_s22, %s7786_s22   ;;  %s6161_s21 = sphi %s6321_s21, %s7785_s21  }
  0x25   : > { %7699 = sst [smem:[#allocation42_spill]] %s6177_s25  ;;  %p4486_p0 = scmp.ge.s32.totalorder %s6201_s0, 1 }
  0x26   : > { %7700 = sst [smem:[#allocation43_spill]] %s6181_s26  ;;  %p7656_p1 = scmp.eq.s32.totalorder %s6377_s17, 0 }
  0x27   : > { %7701 = sst [smem:[#allocation44_spill]] %s6185_s27  ;;  %p440_p2 = scmp.lt.s32.totalorder %s6201_s0, 5 }
  0x28   : > { %7702 = sst [smem:[#allocation45_spill]] %s6189_s28  ;;  %s6203_s19 = smov [#allocation9]  }
  0x29   : > { %7703 = sst [smem:[#allocation46_spill]] %s6193_s29  ;;  %p6382_p3 = pnand %p4486_p0, %p440_p2 }
  0x2a   : > { %s452_s20 = sshll.u32 %s6203_s19, 4  ;;  %s6204_s28 = smov [#allocation12]   ;;  %s6386_s20 = int_to_ptr.vmem [resolvable:$true] %s452_s20 }
  0x2b   : > { %s7704_s18 = scalar_select %p6382_p3, 1, 0 }
  0x2c   : > { %p5305_p4 = pneg %p6382_p3  ;;  %s476_s27 = sshll.u32 %s6204_s28, 4  ;;  %s6396_s27 = int_to_ptr.vmem [resolvable:$true] %s476_s27 }
  0x2d   : > { %7705 = sst [smem:[#allocation47_spill]] %s7704_s18  ;;  %s6205_s2 = smov [#allocation15]  }
  0x2e   : > { %p6392_p5 = pnand %p5305_p4, %p7656_p1  ;;  %s6398_s24 = sshll.u32 %s6205_s2, 4  ;;  %s502_s24 = int_to_ptr.vmem [resolvable:$true] %s6398_s24 }
  0x2f   : > { %s7707_s3 = sld [smem:[#allocation54_spill]] }
  0x30   : > { %s7706_s16 = scalar_select %p6392_p5, 1, 0 }
  0x31   : > { %p6408_p7 = pneg %p6392_p5 }
  0x35   : > { %s5589_s19 = scalar_lea.hbm %s7707_s3, 1024 }
  0x36   : > { %p5590_p6 = scmp.ne.s32.totalorder %s7707_s3, %s5589_s19  ;;  %p5596_p10 = scmp.lt.u32.totalorder %s5589_s19, %s7707_s3 }
  0x38   : > { %p5592_p8 = pnand %p6408_p7, %p5590_p6 }
  0x3a   : > { %p5593_p9 = pneg %p5592_p8 }
  0x3c   : > { %p5598_p11 = pnand %p5596_p10, %p5593_p9 }
  0x3e   : > { %5601 = shalt.err (!%p5598_p11)
}
  0x3f   : > { %s5602_s15 = scalar_lea.vmem %s6386_s20, 1024  ;;  %p5610_p2 = scmp.lt.s32.totalorder %s6386_s20, %s6386_s20 }
  0x40   : > { %p5603_p12 = scmp.ne.s32.totalorder %s6386_s20, %s5602_s15  ;;  %p5611_p4 = scmp.lt.s32.totalorder %s5602_s15, %s5602_s15 }
  0x42   : > { %p5605_p13 = pnand %p5603_p12, %p6408_p7  ;;  %p5612_p6 = por %p5611_p4, %p5610_p2 }
  0x44   : > { %p5606_p0 = pneg %p5605_p13 }
  0x46   : > { %p5613_p8 = pnand %p5612_p6, %p5606_p0 }
  0x48   : > { %5616 = shalt.err (!%p5613_p8)
}
  0x49   : > { %s7658_s25 = smov 128   ;;  %s7660_s26 = smov 8  }
  0x4a   : > { %5308 = dma.hbm_to_vmem [thread:$0]  (!%p6392_p5), %s7707_s3, 1024, %s6386_s20, [#allocation10], %s7658_s25, %s7658_s25, %s7660_s26  }
  0x4b   : > { %s7709_s5 = sld [smem:[#allocation56_spill]] }
  0x51   : > { %s5617_s15 = scalar_lea.hbm %s7709_s5, 1024 }
  0x52   : > { %p5618_p9 = scmp.ne.s32.totalorder %s7709_s5, %s5617_s15  ;;  %p5624_p12 = scmp.lt.u32.totalorder %s5617_s15, %s7709_s5 }
  0x54   : > { %p5620_p10 = pnand %p5618_p9, %p6408_p7 }
  0x56   : > { %p5621_p11 = pneg %p5620_p10 }
  0x58   : > { %p5626_p13 = pnand %p5624_p12, %p5621_p11 }
  0x5a   : > { %5629 = shalt.err (!%p5626_p13)
}
  0x5b   : > { %s5630_s20 = scalar_lea.vmem %s6396_s27, 1024  ;;  %p5638_p6 = scmp.lt.s32.totalorder %s6396_s27, %s6396_s27 }
  0x5c   : > { %p5631_p0 = scmp.ne.s32.totalorder %s6396_s27, %s5630_s20  ;;  %p5639_p8 = scmp.lt.s32.totalorder %s5630_s20, %s5630_s20 }
  0x5e   : > { %p5633_p2 = pnand %p5631_p0, %p6408_p7  ;;  %p5640_p9 = por %p5639_p8, %p5638_p6 }
  0x60   : > { %p5634_p4 = pneg %p5633_p2 }
  0x62   : > { %p5641_p10 = pnand %p5640_p9, %p5634_p4 }
  0x64   : > { %5644 = shalt.err (!%p5641_p10)
}
  0x65   : > { %5314 = dma.hbm_to_vmem [thread:$0]  (!%p6392_p5), %s7709_s5, 1024, %s6396_s27, [#allocation13], %s7658_s25, %s7658_s25, %s7660_s26  }
  0x66   : > { %s7710_s7 = sld [smem:[#allocation58_spill]] }
  0x6c   : > { %s5645_s18 = scalar_lea.hbm %s7710_s7, 16 }
  0x6d   : > { %p5646_p11 = scmp.ne.s32.totalorder %s7710_s7, %s5645_s18  ;;  %p5652_p0 = scmp.lt.u32.totalorder %s5645_s18, %s7710_s7 }
  0x6f   : > { %p5648_p12 = pnand %p5646_p11, %p6408_p7 }
  0x71   : > { %p5649_p13 = pneg %p5648_p12 }
  0x73   : > { %p5654_p2 = pnand %p5652_p0, %p5649_p13 }
  0x75   : > { %5657 = shalt.err (!%p5654_p2)
}
  0x76   : > { %s5658_s20 = scalar_lea.vmem %s502_s24, 16  ;;  %s5665_s27 = scalar_lea.vmem %s502_s24, 32 }
  0x77   : > { %p5659_p4 = scmp.ne.s32.totalorder %s502_s24, %s5658_s20  ;;  %p5666_p9 = scmp.lt.s32.totalorder %s502_s24, %s502_s24 }
  0x78   : > { %p5667_p10 = scmp.lt.s32.totalorder %s5665_s27, %s5658_s20 }
  0x79   : > { %p5661_p6 = pnand %p5659_p4, %p6408_p7 }
  0x7a   : > { %p5668_p1 = por %p5667_p10, %p5666_p9 }
  0x7b   : > { %p5662_p8 = pneg %p5661_p6 }
  0x7d   : > { %p5669_p3 = pnand %p5668_p1, %p5662_p8 }
  0x7f   : > { %5672 = shalt.err (!%p5669_p3)
}
  0x80   : > { %5320 = dma.hbm_to_vmem [thread:$0]  (!%p6392_p5), %s7710_s7, 16, %s502_s24, [#allocation16]  }
  0x81   : > { %s6208_s10 = smov [#allocation18]   ;;  %s6209_s18 = smov [#allocation21]  }
  0x82   : > { %s522_s12 = sshll.u32 %s6208_s10, 4  ;;  %s549_s19 = sshll.u32 %s6209_s18, 4  ;;  %s523_s12 = int_to_ptr.vmem [resolvable:$true] %s522_s12  ;;  %s550_s19 = int_to_ptr.vmem [resolvable:$true] %s549_s19 }
  0x83   : > { %s7711_s9 = sld [smem:[#allocation60_spill]] }
  0x89   : > { %s5673_s15 = scalar_lea.hbm %s7711_s9, 256 }
  0x8a   : > { %p5674_p1 = scmp.ne.s32.totalorder %s7711_s9, %s5673_s15  ;;  %p5680_p12 = scmp.lt.u32.totalorder %s5673_s15, %s7711_s9 }
  0x8c   : > { %p5676_p3 = pnand %p5674_p1, %p6408_p7 }
  0x8e   : > { %p5677_p11 = pneg %p5676_p3 }
  0x90   : > { %p5682_p13 = pnand %p5680_p12, %p5677_p11 }
  0x92   : > { %5685 = shalt.err (!%p5682_p13)
}
  0x93   : > { %s5686_s24 = scalar_lea.vmem %s523_s12, 256  ;;  %p5694_p6 = scmp.lt.s32.totalorder %s523_s12, %s523_s12 }
  0x94   : > { %p5687_p0 = scmp.ne.s32.totalorder %s523_s12, %s5686_s24  ;;  %p5695_p8 = scmp.lt.s32.totalorder %s5686_s24, %s5686_s24 }
  0x96   : > { %p5689_p2 = pnand %p5687_p0, %p6408_p7  ;;  %p5696_p9 = por %p5695_p8, %p5694_p6 }
  0x98   : > { %p5690_p4 = pneg %p5689_p2 }
  0x9a   : > { %p5697_p10 = pnand %p5696_p9, %p5690_p4 }
  0x9c   : > { %5700 = shalt.err (!%p5697_p10)
}
  0x9d   : > { %s7712_s8 = smov 128   ;;  %s7713_s11 = sld [smem:[#allocation62_spill]] }
  0x9e   : > { %5326 = dma.hbm_to_vmem [thread:$0]  (!%p6392_p5), %s7711_s9, 256, %s523_s12, [#allocation19], %s7712_s8, %s7712_s8, %s7660_s26  }
  0xa3   : > { %s5701_s2 = scalar_lea.hbm %s7713_s11, 16 }
  0xa4   : > { %p5702_p1 = scmp.ne.s32.totalorder %s7713_s11, %s5701_s2  ;;  %p5708_p12 = scmp.lt.u32.totalorder %s5701_s2, %s7713_s11 }
  0xa6   : > { %p5704_p3 = pnand %p5702_p1, %p6408_p7 }
  0xa8   : > { %p5705_p11 = pneg %p5704_p3 }
  0xaa   : > { %p5710_p13 = pnand %p5708_p12, %p5705_p11 }
  0xac   : > { %5713 = shalt.err (!%p5710_p13)
}
  0xad   : > { %s5714_s24 = scalar_lea.vmem %s550_s19, 16  ;;  %s5721_s12 = scalar_lea.vmem %s550_s19, 32 }
  0xae   : > { %p5715_p0 = scmp.ne.s32.totalorder %s550_s19, %s5714_s24  ;;  %p5722_p6 = scmp.lt.s32.totalorder %s550_s19, %s550_s19 }
  0xaf   : > { %p5723_p8 = scmp.lt.s32.totalorder %s5721_s12, %s5714_s24 }
  0xb0   : > { %p5717_p2 = pnand %p5715_p0, %p6408_p7 }
  0xb1   : > { %p5724_p9 = por %p5723_p8, %p5722_p6 }
  0xb2   : > { %p5718_p4 = pneg %p5717_p2 }
  0xb4   : > { %p5725_p10 = pnand %p5724_p9, %p5718_p4 }
  0xb6   : > { %5728 = shalt.err (!%p5725_p10)
}
  0xb7   : > { %5332 = dma.hbm_to_vmem [thread:$0]  (!%p6392_p5), %s7713_s11, 16, %s550_s19, [#allocation22]  }
  0xb8   : > { %s6210_s18 = smov [#allocation24]   ;;  %s7714_s13 = sld [smem:[#allocation64_spill]] }
  0xb9   : > { %s573_s28 = sshll.u32 %s6210_s18, 4  ;;  %s574_s28 = int_to_ptr.vmem [resolvable:$true] %s573_s28 }
  0xbe   : > { %s5729_s20 = scalar_lea.hbm %s7714_s13, 16 }
  0xbf   : > { %p5730_p1 = scmp.ne.s32.totalorder %s7714_s13, %s5729_s20  ;;  %p5736_p12 = scmp.lt.u32.totalorder %s5729_s20, %s7714_s13 }
  0xc1   : > { %p5732_p3 = pnand %p5730_p1, %p6408_p7 }
  0xc3   : > { %p5733_p11 = pneg %p5732_p3 }
  0xc5   : > { %p5738_p13 = pnand %p5736_p12, %p5733_p11 }
  0xc7   : > { %5741 = shalt.err (!%p5738_p13)
}
  0xc8   : > { %s5742_s19 = scalar_lea.vmem %s574_s28, 16  ;;  %s5749_s25 = scalar_lea.vmem %s574_s28, 32 }
  0xc9   : > { %p5743_p0 = scmp.ne.s32.totalorder %s574_s28, %s5742_s19  ;;  %p5750_p6 = scmp.lt.s32.totalorder %s574_s28, %s574_s28 }
  0xca   : > { %p5751_p8 = scmp.lt.s32.totalorder %s5749_s25, %s5742_s19 }
  0xcb   : > { %p5745_p2 = pnand %p5743_p0, %p6408_p7 }
  0xcc   : > { %p5752_p9 = por %p5751_p8, %p5750_p6 }
  0xcd   : > { %p5746_p4 = pneg %p5745_p2 }
  0xcf   : > { %p5753_p10 = pnand %p5752_p9, %p5746_p4 }
  0xd1   : > { %5756 = shalt.err (!%p5753_p10)
}
  0xd2   : > { %5338 = dma.hbm_to_vmem [thread:$0]  (!%p6392_p5), %s7714_s13, 16, %s574_s28, [#allocation25]  }
  0xd3   : > { %s4485_s2 = sadd.s32 4294967294, %s6201_s0   ;;  %s51_s15 = sadd.s32 1, %s6193_s29 }
  0xd4   : > { %p52_p1 = scmp.ge.s32.totalorder %s51_s15, 2  ;;  %s54_s20 = sadd.s32 1, %s6197_s30 }
  0xd5   : > { %p7665_p3 = scmp.eq.s32.totalorder %s6201_s0, 0  ;;  %s89_s27 = sadd.s32 1, %s6169_s23 }
  0xd6   : > { %s7792_s15 = smov (%p52_p1, %s51_s15), 0  ;;  %s7794_s20 = smov (!%p52_p1, %s54_s20), %s6197_s30 }
  0xd7   : > { %7715 = sst [smem:[#allocation48_spill]] %s7792_s15  ;;  %s85_s6 = ssub.s32 %s6193_s29, %s7792_s15 }
  0xd8   : > { %p96_p11 = scmp.ne.s32.totalorder %s6169_s23, %s6165_s22  ;;  %p56_p12 = scmp.ge.s32.totalorder %s7794_s20, 2 }
  0xd9   : > { %p102_p13 = scmp.ne.s32.totalorder %s6165_s22, %s6161_s21  ;;  %p427_p2 = scmp.eq.s32.totalorder %s6377_s17, 3 }
  0xda   : > { %p6550_p0 = por %p96_p11, %p7665_p3  ;;  %s7796_s20 = smov (%p56_p12, %s7794_s20), 0 }
  0xdb   : > { %7717 = sst [smem:[#allocation49_spill]] %s7796_s20  ;;  %p7718_p4 = scmp.eq.s32.totalorder %s6377_s17, 0 }
  0xdc   : > { %p6563_p8 = por %p427_p2, %p96_p11  ;;  %s6569_s19 = ssub.s32 %s6197_s30, %s7796_s20 }
  0xdd   : > { %p6559_p6 = por %p102_p13, %p7718_p4  ;;  %p433_p9 = scmp.eq.s32.totalorder %s4485_s2, 3 }
  0xde   : > { %s7720_s12 = scalar_select %p6563_p8, 1, 0 }
  0xdf   : > { %s7719_s24 = scalar_select %p6559_p6, 1, 0 }
  0xe0   : > { %s86_s25 = sor.u32 %s85_s6, %s6569_s19  ;;  %p6573_p12 = por %p433_p9, %p102_p13 }
  0xe1   : > { %p87_p1 = scmp.eq.s32.totalorder %s86_s25, 0  ;;  %p7664_p4 = scmp.lt.s32.totalorder %s6201_s0, 4 }
  0xe2   : > { %s7721_s10 = scalar_select %p6573_p12, 1, 0 }
  0xe3   : > { %s6579_s18 = scalar_select %p87_p1, %s6169_s23, %s89_s27  }
  0xe4   : > { %s627_s26 = sand.u32 1, %s6201_s0   ;;  %s629_s3 = sand.u32 1, %s6169_s23  }
  0xe5   : > { %7722 = sst [smem:[#allocation50_spill]] %s6579_s18  ;;  %s4504_s5 = sshll.u32 %s629_s3, 6 }
  0xe6   : > { %s4604_s7 = sshll.u32 %s6193_s29, 4  ;;  %s4507_s9 = sshll.u32 %s6197_s30, 5 }
  0xe7   : > { %s638_s11 = sadd.s32 %s4604_s7, %s4507_s9  ;;  %s631_s13 = scalar_lea.vmem [#allocation6], %s4504_s5 }
  0xe8   : > { %s641_s2 = sshll.u32 %s631_s13, 4  ;;  %s4508_s20 = sshll.u32 %s638_s11, 6  ;;  %s6585_s2 = int_to_ptr.vmem [resolvable:$true] %s641_s2 }
  0xe9   : > { %s7723_s1 = sld [smem:[#allocation52_spill]]  ;;  %p6596_p11 = pnand %p7664_p4, %p6550_p0 }
  0xea   : > { %s6211_s5 = smov [#allocation11]   ;;  %s6602_s9 = scalar_lea.sflag [#allocation7], %s627_s26 }
  0xeb   : > { %s6600_s7 = sshll.u32 %s6211_s5, 4  ;;  %p5759_p2 = pneg %p6596_p11  ;;  %s467_s7 = int_to_ptr.vmem [resolvable:$true] %s6600_s7 }
  0xef   : > { %s6590_s15 = scalar_lea.hbm %s7723_s1, %s4508_s20  ;;  %s5762_s27 = scalar_lea.hbm %s7723_s1, 4096 }
  0xf0   : > { %s5757_s11 = scalar_lea.hbm %s6590_s15, 1024  ;;  %p5763_p0 = scmp.lt.u32.totalorder %s6590_s15, %s7723_s1 }
  0xf1   : > { %p5758_p13 = scmp.ne.s32.totalorder %s6590_s15, %s5757_s11  ;;  %p5764_p4 = scmp.lt.u32.totalorder %s5762_s27, %s5757_s11 }
  0xf2   : > { %p5766_p10 = scmp.lt.u32.totalorder %s5757_s11, %s6590_s15 }
  0xf3   : > { %p5760_p9 = pnand %p5759_p2, %p5758_p13  ;;  %p5765_p3 = por %p5764_p4, %p5763_p0 }
  0xf5   : > { %p5761_p1 = pneg %p5760_p9  ;;  %p5767_p12 = por %p5766_p10, %p5765_p3 }
  0xf7   : > { %p5768_p8 = pnand %p5767_p12, %p5761_p1 }
  0xf9   : > { %5771 = shalt.err (!%p5768_p8)
}
  0xfa   : > { %s5772_s26 = scalar_lea.vmem %s6585_s2, 1024  ;;  %s6212_s25 = smov [#allocation6]  }
  0xfb   : > { %p5773_p13 = scmp.ne.s32.totalorder %s6585_s2, %s5772_s26  ;;  %s5777_s5 = sshll.u32 %s6212_s25, 4  ;;  %s5778_s5 = int_to_ptr.vmem [resolvable:$false] %s5777_s5 }
  0xfc   : > { %s5779_s13 = scalar_lea.vmem %s5778_s5, 2048  ;;  %p5780_p5 = scmp.lt.s32.totalorder %s6585_s2, %s5778_s5 }
  0xfd   : > { %p5775_p9 = pnand %p5773_p13, %p5759_p2  ;;  %p5781_p4 = scmp.lt.s32.totalorder %s5779_s13, %s5772_s26 }
  0xff   : > { %p5776_p6 = pneg %p5775_p9  ;;  %p5782_p0 = por %p5781_p4, %p5780_p5 }
 0x101   : > { %p5783_p3 = pnand %p5782_p0, %p5776_p6 }
 0x103   : > { %5786 = shalt.err (!%p5783_p3)
}
 0x104   : > { %s7670_s11 = smov 64   ;;  %s7671_s20 = smov 4  }
 0x105   : > { %5351 = dma.hbm_to_vmem [thread:$0]  (!%p6596_p11), %s6590_s15, 1024, %s6585_s2, %s6602_s9, %s7670_s11, %s7670_s11, %s7671_s20  }
 0x106   : > { %s6215_s27 = smov [#allocation14]   ;;  %s7725_s4 = sld [smem:[#allocation55_spill]] }
 0x107   : > { %s490_s28 = sshll.u32 %s6215_s27, 4  ;;  %s491_s28 = int_to_ptr.vmem [resolvable:$true] %s490_s28 }
 0x10c   : > { %s5787_s25 = scalar_lea.hbm %s7725_s4, 16 }
 0x10d   : > { %p5788_p5 = scmp.ne.s32.totalorder %s7725_s4, %s5787_s25  ;;  %p5794_p10 = scmp.lt.u32.totalorder %s5787_s25, %s7725_s4 }
 0x10f   : > { %p5790_p6 = pnand %p5788_p5, %p6408_p7 }
 0x111   : > { %p5791_p8 = pneg %p5790_p6 }
 0x113   : > { %p5796_p12 = pnand %p5794_p10, %p5791_p8 }
 0x115   : > { %5799 = shalt.err (!%p5796_p12)
}
 0x116   : > { %s5800_s15 = scalar_lea.vmem %s467_s7, 16  ;;  %s5807_s2 = scalar_lea.vmem %s467_s7, 32 }
 0x117   : > { %p5801_p11 = scmp.ne.s32.totalorder %s467_s7, %s5800_s15  ;;  %p5808_p13 = scmp.lt.s32.totalorder %s467_s7, %s467_s7 }
 0x118   : > { %p5809_p9 = scmp.lt.s32.totalorder %s5807_s2, %s5800_s15 }
 0x119   : > { %p5803_p2 = pnand %p5801_p11, %p6408_p7 }
 0x11a   : > { %p5810_p4 = por %p5809_p9, %p5808_p13 }
 0x11b   : > { %p5804_p1 = pneg %p5803_p2 }
 0x11d   : > { %p5811_p0 = pnand %p5810_p4, %p5804_p1 }
 0x11f   : > { %5814 = shalt.err (!%p5811_p0)
}
 0x120   : > { %p7726_p3 = scmp.ne.s32.totalorder %s7706_s16, 0  ;;  %s7727_s25 = sld [smem:[#allocation57_spill]] }
 0x122   : > { %5311 = dma.hbm_to_vmem [thread:$0]  (!%p7726_p3), %s7725_s4, 16, %s467_s7, [#allocation10]  }
 0x126   : > { %s7728_s5 = smov %s7727_s25  ;;  %s5815_s13 = scalar_lea.hbm %s7727_s25, 16 }
 0x127   : > { %p5816_p5 = scmp.ne.s32.totalorder %s7728_s5, %s5815_s13  ;;  %p5822_p10 = scmp.lt.u32.totalorder %s5815_s13, %s7728_s5 }
 0x129   : > { %p5818_p6 = pnand %p5816_p5, %p6408_p7 }
 0x12b   : > { %p5819_p8 = pneg %p5818_p6 }
 0x12d   : > { %p5824_p12 = pnand %p5822_p10, %p5819_p8 }
 0x12f   : > { %5827 = shalt.err (!%p5824_p12)
}
 0x130   : > { %s5828_s27 = scalar_lea.vmem %s491_s28, 16  ;;  %s5835_s7 = scalar_lea.vmem %s491_s28, 32 }
 0x131   : > { %p5829_p11 = scmp.ne.s32.totalorder %s491_s28, %s5828_s27  ;;  %p5836_p13 = scmp.lt.s32.totalorder %s491_s28, %s491_s28 }
 0x132   : > { %p5837_p9 = scmp.lt.s32.totalorder %s5835_s7, %s5828_s27 }
 0x133   : > { %p5831_p2 = pnand %p5829_p11, %p6408_p7 }
 0x134   : > { %p5838_p4 = por %p5837_p9, %p5836_p13 }
 0x135   : > { %p5832_p1 = pneg %p5831_p2 }
 0x137   : > { %p5839_p0 = pnand %p5838_p4, %p5832_p1 }
 0x139   : > { %5842 = shalt.err (!%p5839_p0)
}
 0x13a   : > { %5317 = dma.hbm_to_vmem [thread:$0]  (!%p7726_p3), %s7728_s5, 16, %s491_s28, [#allocation13]  }
 0x13b   : > { %s6216_s1 = smov [#allocation17]   ;;  %s6217_s25 = smov [#allocation20]  }
 0x13c   : > { %s512_s26 = sshll.u32 %s6216_s1, 4  ;;  %s535_s13 = sshll.u32 %s6217_s25, 4  ;;  %s513_s26 = int_to_ptr.vmem [resolvable:$true] %s512_s26  ;;  %s536_s13 = int_to_ptr.vmem [resolvable:$true] %s535_s13 }
 0x13d   : > { %s7729_s2 = sld [smem:[#allocation59_spill]] }
 0x143   : > { %s5843_s20 = scalar_lea.hbm %s7729_s2, 16 }
 0x144   : > { %p5844_p5 = scmp.ne.s32.totalorder %s7729_s2, %s5843_s20  ;;  %p5850_p10 = scmp.lt.u32.totalorder %s5843_s20, %s7729_s2 }
 0x146   : > { %p5846_p6 = pnand %p5844_p5, %p6408_p7 }
 0x148   : > { %p5847_p8 = pneg %p5846_p6 }
 0x14a   : > { %p5852_p12 = pnand %p5850_p10, %p5847_p8 }
 0x14c   : > { %5855 = shalt.err (!%p5852_p12)
}
 0x14d   : > { %s5856_s28 = scalar_lea.vmem %s513_s26, 16  ;;  %s5863_s6 = scalar_lea.vmem %s513_s26, 32 }
 0x14e   : > { %p5857_p11 = scmp.ne.s32.totalorder %s513_s26, %s5856_s28  ;;  %p5864_p13 = scmp.lt.s32.totalorder %s513_s26, %s513_s26 }
 0x14f   : > { %p5865_p9 = scmp.lt.s32.totalorder %s5863_s6, %s5856_s28 }
 0x150   : > { %p5859_p2 = pnand %p5857_p11, %p6408_p7 }
 0x151   : > { %p5866_p4 = por %p5865_p9, %p5864_p13 }
 0x152   : > { %p5860_p1 = pneg %p5859_p2 }
 0x154   : > { %p5867_p0 = pnand %p5866_p4, %p5860_p1 }
 0x156   : > { %5870 = shalt.err (!%p5867_p0)
}
 0x157   : > { %5323 = dma.hbm_to_vmem [thread:$0]  (!%p7726_p3), %s7729_s2, 16, %s513_s26, [#allocation16]  }
 0x158   : > { %s7730_s3 = sld [smem:[#allocation61_spill]] }
 0x15e   : > { %s5871_s15 = scalar_lea.hbm %s7730_s3, 512 }
 0x15f   : > { %p5872_p5 = scmp.ne.s32.totalorder %s7730_s3, %s5871_s15  ;;  %p5878_p10 = scmp.lt.u32.totalorder %s5871_s15, %s7730_s3 }
 0x161   : > { %p5874_p6 = pnand %p5872_p5, %p6408_p7 }
 0x163   : > { %p5875_p8 = pneg %p5874_p6 }
 0x165   : > { %p5880_p12 = pnand %p5878_p10, %p5875_p8 }
 0x167   : > { %5883 = shalt.err (!%p5880_p12)
}
 0x168   : > { %s5884_s6 = scalar_lea.vmem %s536_s13, 512  ;;  %p5892_p13 = scmp.lt.s32.totalorder %s536_s13, %s536_s13 }
 0x169   : > { %p5885_p11 = scmp.ne.s32.totalorder %s536_s13, %s5884_s6  ;;  %p5893_p9 = scmp.lt.s32.totalorder %s5884_s6, %s5884_s6 }
 0x16b   : > { %p5887_p2 = pnand %p5885_p11, %p6408_p7  ;;  %p5894_p4 = por %p5893_p9, %p5892_p13 }
 0x16d   : > { %p5888_p1 = pneg %p5887_p2 }
 0x16f   : > { %p5895_p0 = pnand %p5894_p4, %p5888_p1 }
 0x171   : > { %5898 = shalt.err (!%p5895_p0)
}
 0x172   : > { %s7731_s26 = smov 8   ;;  %s6218_s4 = smov [#allocation23]  }
 0x173   : > { %5329 = dma.hbm_to_vmem [thread:$0]  (!%p7726_p3), %s7730_s3, 512, %s536_s13, [#allocation19], %s7712_s8, %s7712_s8, %s7731_s26  }
 0x174   : > { %s559_s20 = sshll.u32 %s6218_s4, 4  ;;  %s6219_s15 = smov [#allocation26]   ;;  %s560_s20 = int_to_ptr.vmem [resolvable:$true] %s559_s20 }
 0x175   : > { %s584_s27 = sshll.u32 %s6219_s15, 4  ;;  %s7732_s28 = sld [smem:[#allocation63_spill]]  ;;  %s585_s27 = int_to_ptr.vmem [resolvable:$true] %s584_s27 }
 0x17b   : > { %s7733_s6 = smov %s7732_s28  ;;  %s5899_s2 = scalar_lea.hbm %s7732_s28, 1024 }
 0x17c   : > { %p5900_p5 = scmp.ne.s32.totalorder %s7733_s6, %s5899_s2  ;;  %p5906_p10 = scmp.lt.u32.totalorder %s5899_s2, %s7733_s6 }
 0x17e   : > { %p5902_p6 = pnand %p5900_p5, %p6408_p7 }
 0x180   : > { %p5903_p8 = pneg %p5902_p6 }
 0x182   : > { %p5908_p12 = pnand %p5906_p10, %p5903_p8 }
 0x184   : > { %5911 = shalt.err (!%p5908_p12)
}
 0x185   : > { %s5912_s13 = scalar_lea.vmem %s560_s20, 1024  ;;  %p5920_p13 = scmp.lt.s32.totalorder %s560_s20, %s560_s20 }
 0x186   : > { %p5913_p11 = scmp.ne.s32.totalorder %s560_s20, %s5912_s13  ;;  %p5921_p9 = scmp.lt.s32.totalorder %s5912_s13, %s5912_s13 }
 0x188   : > { %p5915_p2 = pnand %p5913_p11, %p6408_p7  ;;  %p5922_p4 = por %p5921_p9, %p5920_p13 }
 0x18a   : > { %p5916_p1 = pneg %p5915_p2 }
 0x18c   : > { %p5923_p0 = pnand %p5922_p4, %p5916_p1 }
 0x18e   : > { %5926 = shalt.err (!%p5923_p0)
}
 0x18f   : > { %5335 = dma.hbm_to_vmem [thread:$0]  (!%p7726_p3), %s7733_s6, 1024, %s560_s20, [#allocation22], %s7712_s8, %s7712_s8, %s7731_s26  }
 0x190   : > { %s7734_s25 = sld [smem:[#allocation65_spill]] }
 0x196   : > { %s7735_s4 = smov %s7734_s25  ;;  %s5927_s15 = scalar_lea.hbm %s7734_s25, 16 }
 0x197   : > { %p5928_p5 = scmp.ne.s32.totalorder %s7735_s4, %s5927_s15  ;;  %p5934_p10 = scmp.lt.u32.totalorder %s5927_s15, %s7735_s4 }
 0x199   : > { %p5930_p6 = pnand %p5928_p5, %p6408_p7 }
 0x19b   : > { %p5931_p8 = pneg %p5930_p6 }
 0x19d   : > { %p5936_p12 = pnand %p5934_p10, %p5931_p8 }
 0x19f   : > { %5939 = shalt.err (!%p5936_p12)
}
 0x1a0   : > { %s5940_s13 = scalar_lea.vmem %s585_s27, 16  ;;  %s5947_s8 = scalar_lea.vmem %s585_s27, 32 }
 0x1a1   : > { %p5941_p11 = scmp.ne.s32.totalorder %s585_s27, %s5940_s13  ;;  %p5948_p13 = scmp.lt.s32.totalorder %s585_s27, %s585_s27 }
 0x1a2   : > { %p5949_p9 = scmp.lt.s32.totalorder %s5947_s8, %s5940_s13 }
 0x1a3   : > { %p5943_p2 = pnand %p5941_p11, %p6408_p7 }
 0x1a4   : > { %p5950_p4 = por %p5949_p9, %p5948_p13 }
 0x1a5   : > { %p5944_p1 = pneg %p5943_p2 }
 0x1a7   : > { %p5951_p0 = pnand %p5950_p4, %p5944_p1 }
 0x1a9   : > { %5954 = shalt.err (!%p5951_p0)
}
 0x1aa   : > { %5341 = dma.hbm_to_vmem [thread:$0]  (!%p7726_p3), %s7735_s4, 16, %s585_s27, [#allocation25]  }
 0x1ab   : > { %s6220_s29 = smov [#allocation27]   ;;  %s7736_s25 = sld [smem:[#allocation66_spill]] }
 0x1ac   : > { %s595_s18 = sshll.u32 %s6220_s29, 4  ;;  %s596_s18 = int_to_ptr.vmem [resolvable:$true] %s595_s18 }
 0x1b1   : > { %s7737_s15 = smov %s7736_s25  ;;  %s5955_s7 = scalar_lea.hbm %s7736_s25, 16 }
 0x1b2   : > { %p5956_p5 = scmp.ne.s32.totalorder %s7737_s15, %s5955_s7  ;;  %p5962_p10 = scmp.lt.u32.totalorder %s5955_s7, %s7737_s15 }
 0x1b4   : > { %p5958_p6 = pnand %p5956_p5, %p6408_p7 }
 0x1b6   : > { %p5959_p8 = pneg %p5958_p6 }
 0x1b8   : > { %p5964_p12 = pnand %p5962_p10, %p5959_p8 }
 0x1ba   : > { %5967 = shalt.err (!%p5964_p12)
}
 0x1bb   : > { %s5968_s27 = scalar_lea.vmem %s596_s18, 16  ;;  %s5975_s8 = scalar_lea.vmem %s596_s18, 32 }
 0x1bc   : > { %p5969_p11 = scmp.ne.s32.totalorder %s596_s18, %s5968_s27  ;;  %p5976_p13 = scmp.lt.s32.totalorder %s596_s18, %s596_s18 }
 0x1bd   : > { %p5977_p9 = scmp.lt.s32.totalorder %s5975_s8, %s5968_s27 }
 0x1be   : > { %p5971_p2 = pnand %p5969_p11, %p6408_p7 }
 0x1bf   : > { %p5978_p4 = por %p5977_p9, %p5976_p13 }
 0x1c0   : > { %p5972_p1 = pneg %p5971_p2 }
 0x1c2   : > { %p5979_p0 = pnand %p5978_p4, %p5972_p1 }
 0x1c4   : > { %5982 = shalt.err (!%p5979_p0)
}
 0x1c5   : > { %s7738_s29 = sld [smem:[#allocation43_spill]]  ;;  %s7739_s5 = sld [smem:[#allocation42_spill]] }
 0x1c6   : > { %s7740_s14 = sld [smem:[#allocation41_spill]]  ;;  %p7741_p5 = scmp.eq.s32.totalorder %s6569_s19, 0 }
 0x1c7   : > { %5344 = dma.hbm_to_vmem [thread:$0]  (!%p7726_p3), %s7737_s15, 16, %s596_s18, [#allocation28]  }
 0x1c8   : > { %p7742_p6 = scmp.eq.s32.totalorder %s6201_s0, 0  ;;  %s4603_s7 = sshll.u32 %s6197_s30, 7 }
 0x1c9   : > { %p7743_p12 = scmp.eq.s32.totalorder %s6377_s17, 0  ;;  %s7745_s13 = sld [smem:[#allocation51_spill]] }
 0x1ca   : > { %p7746_p3 = scmp.lt.s32.totalorder %s6201_s0, 4 }
 0x1cb   : > { %s61_s2 = sadd.s32 1, %s7738_s29  ;;  %p68_p7 = scmp.ne.s32.totalorder %s7738_s29, %s7739_s5 }
 0x1cc   : > { %s6772_s16 = scalar_select %p7741_p5, %s7738_s29, %s61_s2  }
 0x1cd   : > { %p70_p8 = por %p7742_p6, %p68_p7  ;;  %p74_p10 = scmp.ne.s32.totalorder %s7739_s5, %s7740_s14 }
 0x1ce   : > { %s6779_s25 = sand.u32 1, %s7738_s29  }
 0x1cf   : > { %p6784_p11 = por %p7743_p12, %p74_p10  ;;  %s4501_s28 = sshll.u32 %s6779_s25, 3 }
 0x1d0   : > { %s6792_s19 = scalar_lea.hbm %s7745_s13, %s4603_s7  ;;  %p6796_p2 = pnand %p7746_p3, %p70_p8 }
 0x1d1   : > { %s7744_s11 = scalar_select %p6784_p11, 1, 0 }
 0x1d2   : > { %s610_s8 = scalar_lea.vmem [#allocation3], %s4501_s28  ;;  %s607_s20 = scalar_lea.sflag [#allocation4], %s6779_s25 }
 0x1d3   : > { %s617_s26 = sshll.u32 %s610_s8, 4  ;;  %s5983_s29 = scalar_lea.hbm %s6792_s19, 128  ;;  %s6800_s26 = int_to_ptr.vmem [resolvable:$true] %s617_s26 }
 0x1d4   : > { %p5984_p1 = scmp.ne.s32.totalorder %s6792_s19, %s5983_s29  ;;  %p5985_p13 = pneg %p6796_p2 }
 0x1d5   : > { %s5988_s2 = scalar_lea.hbm %s7745_s13, 256  ;;  %p5989_p0 = scmp.lt.u32.totalorder %s6792_s19, %s7745_s13 }
 0x1d6   : > { %p5986_p9 = pnand %p5985_p13, %p5984_p1  ;;  %p5990_p7 = scmp.lt.u32.totalorder %s5988_s2, %s5983_s29 }
 0x1d7   : > { %p5992_p6 = scmp.lt.u32.totalorder %s5983_s29, %s6792_s19 }
 0x1d8   : > { %p5987_p4 = pneg %p5986_p9  ;;  %p5991_p5 = por %p5990_p7, %p5989_p0 }
 0x1da   : > { %p5993_p8 = por %p5992_p6, %p5991_p5 }
 0x1dc   : > { %p5994_p10 = pnand %p5993_p8, %p5987_p4 }
 0x1de   : > { %5997 = shalt.err (!%p5994_p10)
}
 0x1df   : > { %s5998_s28 = scalar_lea.vmem %s6800_s26, 128  ;;  %s6221_s1 = smov [#allocation3]  }
 0x1e0   : > { %p5999_p12 = scmp.ne.s32.totalorder %s6800_s26, %s5998_s28  ;;  %s6003_s8 = sshll.u32 %s6221_s1, 4  ;;  %s6004_s8 = int_to_ptr.vmem [resolvable:$false] %s6003_s8 }
 0x1e1   : > { %s6005_s5 = scalar_lea.vmem %s6004_s8, 256  ;;  %p6006_p9 = scmp.lt.s32.totalorder %s6800_s26, %s6004_s8 }
 0x1e2   : > { %p6001_p3 = pnand %p5999_p12, %p5985_p13  ;;  %p6007_p0 = scmp.lt.s32.totalorder %s6005_s5, %s5998_s28 }
 0x1e4   : > { %p6002_p1 = pneg %p6001_p3  ;;  %p6008_p7 = por %p6007_p0, %p6006_p9 }
 0x1e6   : > { %p6009_p5 = pnand %p6008_p7, %p6002_p1 }
 0x1e8   : > { %6012 = shalt.err (!%p6009_p5)
}
 0x1e9   : > { %s7748_s29 = smov 4   ;;  %s7749_s14 = smov 64  }
 0x1ea   : > { %5348 = dma.hbm_to_vmem [thread:$0]  (!%p6796_p2), %s6792_s19, 128, %s6800_s26, %s607_s20, %s7749_s14, %s7749_s14, %s7748_s29  }
 0x1eb   : > { %s4509_s2 = sshll.u32 %s6197_s30, 4  ;;  %s654_s7 = scalar_lea.vmem [#allocation8], %s6779_s25 }
 0x1ec   : > { %s661_s18 = sshll.u32 %s654_s7, 4  ;;  %s7750_s8 = sld [smem:[#allocation53_spill]]  ;;  %s662_s18 = int_to_ptr.vmem [resolvable:$true] %s661_s18 }
 0x1f2   : > { %s659_s5 = scalar_lea.hbm %s7750_s8, %s4509_s2  ;;  %s6018_s13 = scalar_lea.hbm %s7750_s8, 32 }
 0x1f3   : > { %s6013_s3 = scalar_lea.hbm %s659_s5, 16  ;;  %p6019_p10 = scmp.lt.u32.totalorder %s659_s5, %s7750_s8 }
 0x1f4   : > { %p6014_p4 = scmp.ne.s32.totalorder %s659_s5, %s6013_s3  ;;  %p6020_p12 = scmp.lt.u32.totalorder %s6018_s13, %s6013_s3 }
 0x1f5   : > { %p6022_p1 = scmp.lt.u32.totalorder %s6013_s3, %s659_s5 }
 0x1f6   : > { %p6016_p6 = pnand %p6014_p4, %p5985_p13  ;;  %p6021_p3 = por %p6020_p12, %p6019_p10 }
 0x1f8   : > { %p6017_p8 = pneg %p6016_p6  ;;  %p6023_p9 = por %p6022_p1, %p6021_p3 }
 0x1fa   : > { %p6024_p0 = pnand %p6023_p9, %p6017_p8 }
 0x1fc   : > { %6027 = shalt.err (!%p6024_p0)
}
 0x1fd   : > { %s6028_s25 = scalar_lea.vmem %s662_s18, 16  ;;  %s6222_s26 = smov [#allocation8]  }
 0x1fe   : > { %p6029_p7 = scmp.ne.s32.totalorder %s662_s18, %s6028_s25  ;;  %s6033_s6 = sshll.u32 %s6222_s26, 4  ;;  %s6034_s6 = int_to_ptr.vmem [resolvable:$false] %s6033_s6 }
 0x1ff   : > { %s6035_s4 = scalar_lea.vmem %s6034_s6, 32  ;;  %p6036_p6 = scmp.lt.s32.totalorder %s662_s18, %s6034_s6 }
 0x200   : > { %p6031_p5 = pnand %p6029_p7, %p5985_p13  ;;  %p6037_p11 = scmp.lt.s32.totalorder %s6035_s4, %s6028_s25 }
 0x202   : > { %p6032_p4 = pneg %p6031_p5  ;;  %p6038_p10 = por %p6037_p11, %p6036_p6 }
 0x204   : > { %p6039_p12 = pnand %p6038_p10, %p6032_p4 }
 0x206   : > { %6042 = shalt.err (!%p6039_p12)
}
 0x207   : > { %5354 = dma.hbm_to_vmem [thread:$0]  (!%p6796_p2), %s659_s5, 16, %s662_s18, %s6602_s9  }
 0x208   : > { %s7751_s3 = sld [smem:[#allocation47_spill]] }
 0x20e   : > { %p7752_p8 = scmp.ne.s32.totalorder %s7751_s3, 0 }
 0x20f   : > { %s7753_s15 = sld [smem:[#allocation42_spill]] (!%p7752_p8)  ;;  %p7754_p11 = scmp.ne.s32.totalorder (!%p7752_p8), %s7744_s11, 0 }
 0x210   : > { %670 = sbr.rel (%p7752_p8) target bundleno = 2870 (0xb36), region = 84 }
 0x215   : > { %s6856_s13 = sand.u32 (!%p7752_p8), 1, %s7753_s15  }
 0x216   : > { %s4511_s20 = sshll.u32 (!%p7752_p8), %s6856_s13, 3  ;;  %s673_s29 = scalar_lea.sflag (!%p7752_p8), [#allocation4], %s6856_s13 }
 0x217   : > { %s6860_s14 = scalar_lea.vmem [#allocation3], %s4511_s20 }
 0x218   : > { %6116 = dma.done.wait (%p7754_p11), %s673_s29, 128  }
 0x219   : > { %6118 = vsyncadd (%p7754_p11), %s673_s29, 4294967168  ;;  %s681_s9 = sand.u32 1, %s6377_s17   ;;  %s6868_s27 = sand.u32 1, %s6165_s22  }
 0x21a   : > { %s4512_s2 = sshll.u32 %s6868_s27, 6  ;;  %s682_s7 = scalar_lea.sflag [#allocation7], %s681_s9 }
 0x21b   : > { %s6871_s18 = scalar_lea.vmem [#allocation6], %s4512_s2  ;;  %p7755_p2 = scmp.ne.s32.totalorder %s7719_s24, 0 }
 0x21d   : > { %6120 = dma.done.wait (%p7755_p2), %s682_s7, 1024  }
 0x21e   : > { %6122 = vsyncadd (%p7755_p2), %s682_s7, 4294966272  ;;  %s693_s28 = scalar_lea.vmem [#allocation8], %s6856_s13 }
 0x21f   : > { %6124 = dma.done.wait (%p7754_p11), %s682_s7, 16  }
 0x220   : > { %6126 = vsyncadd (%p7754_p11), %s682_s7, 4294967280  ;;  %p7756_p13 = scmp.eq.s32.totalorder %s6377_s17, 0 }
 0x222   : > { %6128 = dma.done.wait (%p7756_p13), [#allocation10], 1040   ;;  %p7757_p3 = pmov %p7756_p13 }
 0x224   : > { %6130 = vsyncadd (%p7757_p3), [#allocation10], 4294966256  ;;  %p7758_p1 = pmov %p7757_p3 }
 0x226   : > { %6132 = dma.done.wait (%p7758_p1), [#allocation13], 1040   ;;  %p7759_p9 = pmov %p7758_p1 }
 0x227   : > { %p7760_p0 = pmov %p7758_p1 }
 0x228   : > { %6134 = vsyncadd (%p7759_p9), [#allocation13], 4294966256 }
 0x229   : > { %6136 = dma.done.wait (%p7760_p0), [#allocation16], 32   ;;  %p7761_p7 = pmov %p7760_p0 }
 0x22a   : > { %p7762_p5 = pmov %p7760_p0 }
 0x22b   : > { %6138 = vsyncadd (%p7761_p7), [#allocation16], 4294967264 }
 0x22c   : > { %6140 = dma.done.wait (%p7762_p5), [#allocation19], 768   ;;  %p7763_p4 = pmov %p7760_p0 }
 0x22d   : > { %p7764_p6 = pmov %p7760_p0 }
 0x22e   : > { %6142 = vsyncadd (%p7763_p4), [#allocation19], 4294966528 }
 0x22f   : > { %6144 = dma.done.wait (%p7764_p6), [#allocation22], 1040   ;;  %p7765_p10 = pmov %p7760_p0 }
 0x230   : > { %p7766_p12 = pmov %p7760_p0 }
 0x231   : > { %6146 = vsyncadd (%p7765_p10), [#allocation22], 4294966256 }
 0x232   : > { %6148 = dma.done.wait (%p7766_p12), [#allocation25], 32   ;;  %p7767_p8 = pmov %p7760_p0 }
 0x233   : > { %p7768_p11 = pmov %p7760_p0 }
 0x234   : > { %6150 = vsyncadd (%p7767_p8), [#allocation25], 4294967264 }
 0x235   : > { %6152 = dma.done.wait (%p7768_p11), [#allocation28], 16   ;;  %p7769_p2 = pmov %p7760_p0 }
 0x236   : > { %s7770_s24 = sld [smem:[#allocation44_spill]]  ;;  %v6223_v0 = vmov 0.0|0.0   ;;  %vm6224_vm0 = vmmov 0   ;;  %v6225_v1 = vmov 0.0   ;;  %v912_v2 = vld [vmem:[#allocation9] sm:$0xff]  ;;  %v913_v3 = vld [vmem:[#allocation9 + $0x8] sm:$0xff] }
 0x237   : > { %6154 = vsyncadd (%p7769_p2), [#allocation28], 4294967280  ;;  %5093 = vmatprep.subr.bf16.mxu1 %v6223_v0  ;;  %4815 = vmatprep.mubr.msk.f32.mxu1 %vm6224_vm0, %v6225_v1  ;;  %v914_v4 = vld [vmem:[#allocation9 + $0x10] sm:$0xff]  ;;  %v5094_v5 = vpack.c.bf16 %v913_v3, %v912_v2  ;;  %v915_v6 = vld [vmem:[#allocation9 + $0x18] sm:$0xff]  ;;  %vm830_vm1 = vcmask 523264   ;;  %vm1311_vm2 = vcmask 130048  }
 0x238   : > { %v5097_v7 = vpack.c.bf16 %v915_v6, %v914_v4  ;;  %v815_v8 = vld [vmem:[#allocation12] sm:$0xff]  ;;  %v816_v9 = vld [vmem:[#allocation12 + $0x8] sm:$0xff]  ;;  %v817_v10 = vld [vmem:[#allocation12 + $0x10] sm:$0xff]  ;;  %s6226_s19 = smov 80   ;;  %s6227_s25 = smov 112   ;;  %vm1032_vm3 = vcmask 261120  }
 0x239   : > { %5095 = vmatpush3.bf16.msra.mxu1 %v5094_v5  ;;  %v916_v11 = vld [vmem:[#allocation9 + $0x20] sm:$0xff]  ;;  %v917_v12 = vld [vmem:[#allocation9 + $0x28] sm:$0xff]  ;;  %v5077_v13 = vpack.c.bf16 %v816_v9, %v815_v8  ;;  %v918_v21 = vld [vmem:[#allocation9 + $0x30] sm:$0xff]  ;;  %s6228_s26 = smov 96   ;;  %s6231_s6 = smov 64   ;;  %vm3916_vm6 = vcmask 261248  }
 0x23a   : > { %5096 = vmatprep.subr.bf16.mxu1 %v6223_v0  ;;  %v818_v14 = vld [vmem:[#allocation12 + $0x18] sm:$0xff]  ;;  %v819_v16 = vld [vmem:[#allocation12 + $0x20] sm:$0xff]  ;;  %v820_v17 = vld [vmem:[#allocation12 + $0x28] sm:$0xff]  ;;  %v5100_v20 = vpack.c.bf16 %v917_v12, %v916_v11  ;;  %s6232_s4 = smov 16   ;;  %s6233_s3 = smov 48   ;;  %vm4000_vm7 = vcmask 392448  }
 0x23b   : > { %v5081_v15 = vpack.c.bf16 %v818_v14, %v817_v10  ;;  %v4606_v18 = vld [vmem:[%s6860_s14] sm:$0xff]   ;;  %5078 = vmatprep.subr.bf16.mxu0 %v5077_v13  ;;  %v5085_v23 = vpack.c.bf16 %v820_v17, %v819_v16  ;;  %v4532_v34 = vld [vmem:[#allocation11] ss:$0 sm:$0xff]  ;;  %v6959_v41 = vld [vmem:[%s6871_s18 + $0x8] sm:$0xff]   ;;  %s6234_s15 = smov 32   ;;  %vm4084_vm8 = vcmask 523648  }
 0x23c   : > { %s4527_s11 = sshll.u32 %s7770_s24, 3  ;;  %v4607_v19 = vunpack.c.l.bf16 %v4606_v18  ;;  %5080 = vmatpush3.bf16.msra.mxu0 %v5077_v13  ;;  %v919_v22 = vld [vmem:[#allocation9 + $0x38] sm:$0xff]  ;;  %v4608_v30 = vunpack.c.h.bf16 %v4606_v18  ;;  %v1309_v31 = vld [vmem:[#allocation18] sm:$0xff]  ;;  %v1310_v32 = vld [vmem:[#allocation18 + $0x8] sm:$0xff]  ;;  %v4615_v43 = vunpack.c.l.bf16 %v6959_v41  ;;  %v4616_v45 = vunpack.c.h.bf16 %v6959_v41  ;;  %s7775_s13 = sld [smem:[#allocation45_spill]] }
 0x23d   : > { %s809_s1 = sshra.s32 %s4527_s11, 3  ;;  %5098 = vmatpush3.bf16.msra.mxu1 %v5097_v7  ;;  %5082 = vmatprep.subr.bf16.mxu0 %v5081_v15  ;;  %v821_v24 = vld [vmem:[#allocation12 + $0x30] sm:$0xff]  ;;  %v822_v25 = vld [vmem:[#allocation12 + $0x38] sm:$0xff]  ;;  %v5103_v26 = vpack.c.bf16 %v919_v22, %v918_v21  ;;  %v6933_v33 = vpack.c.bf16 %v1310_v32, %v1309_v31  ;;  %v7003_v61 = vld [vmem:[%s6871_s18 + $0x28] sm:$0xff]   ;;  %s4526_s20 = sshll.u32 %s6868_s27, 3 }
 0x23e   : > { %s4528_s17 = sshll.u32 %s809_s1, 2  ;;  %5099 = vmatprep.subr.bf16.mxu1 %v6223_v0  ;;  %4796 = vmatprep.mubr.msk.f32.mxu0 %vm830_vm1, %v4607_v19  ;;  %v5089_v28 = vpack.c.bf16 %v822_v25, %v821_v24  ;;  %v6954_v38 = vld [vmem:[%s6871_s18] sm:$0xff]   ;;  %v6970_v46 = vld [vmem:[%s6871_s18 + $0x10] sm:$0xff]   ;;  %v1039_v47 = vsel %vm1032_vm3, %v4615_v43, 0.0  ;;  %v1042_v49 = vsel %vm1032_vm3, %v4616_v45, 0.0  ;;  %v6981_v51 = vld [vmem:[%s6871_s18 + $0x18] sm:$0xff]   ;;  %v4631_v63 = vunpack.c.l.bf16 %v7003_v61 }
 0x23f   : > { %s812_s5 = scalar_lea.vmem %s6860_s14, %s4528_s17 [#allocation3]  ;;  %v4612_v39 = vunpack.c.h.bf16 %v6954_v38  ;;  %v4611_v40 = vunpack.c.l.bf16 %v6954_v38  ;;  %v4619_v48 = vunpack.c.l.bf16 %v6970_v46  ;;  %v4620_v50 = vunpack.c.h.bf16 %v6970_v46  ;;  %v6992_v56 = vld [vmem:[%s6871_s18 + $0x20] sm:$0xff]   ;;  %v7014_v4 = vld [vmem:[%s6871_s18 + $0x30] sm:$0xff]   ;;  %v7025_v9 = vld [vmem:[%s6871_s18 + $0x38] sm:$0xff]   ;;  %s802_s2 = scalar_lea.vmem [#allocation29], %s4526_s20 }
 0x240   : > { %v6919_v27 = vld [vmem:[%s812_s5] sm:$0xf]  ;;  %5084 = vmatpush3.bf16.msra.mxu0 %v5081_v15  ;;  %v4623_v53 = vunpack.c.l.bf16 %v6981_v51  ;;  %v4624_v55 = vunpack.c.h.bf16 %v6981_v51  ;;  %v4627_v58 = vunpack.c.l.bf16 %v6992_v56  ;;  %v4628_v60 = vunpack.c.h.bf16 %v6992_v56  ;;  %v4529_v17 = vld [vmem:[#allocation14] ss:$0 sm:$0xff]  ;;  %vm7228_vm4 = vmpackc.low %vm1032_vm3, %vm1032_vm3  ;;  %s4232_s7 = sshll.u32 %s802_s2, 4  ;;  %s7776_s11 = sld [smem:[#allocation67_spill]]  ;;  %s7564_s7 = int_to_ptr.vmem [resolvable:$true] %s4232_s7 }
 0x241   : > { %5101 = vmatpush3.bf16.msra.mxu1 %v5100_v20  ;;  %5086 = vmatprep.subr.bf16.mxu0 %v5085_v23  ;;  %v814_v29 = vunpack.c.l.bf16 %v6919_v27  ;;  %v1036_v42 = vsel %vm1032_vm3, %v4612_v39, 0.0  ;;  %v1033_v44 = vsel %vm1032_vm3, %v4611_v40, 0.0  ;;  %v1045_v52 = vsel %vm1032_vm3, %v4619_v48, 0.0  ;;  %vm7368_vm5 = vmpackc.low %vm1311_vm2, %vm1311_vm2  ;;  %s6043_s17 = scalar_lea.vmem %s7564_s7, 128  ;;  %p7777_p3 = scmp.ne.s32.totalorder %s7720_s12, 0 }
 0x242   : > { %5102 = vmatprep.subr.bf16.mxu1 %v6223_v0  ;;  %v1048_v54 = vsel %vm1032_vm3, %v4620_v50, 0.0  ;;  %v1051_v57 = vsel %vm1032_vm3, %v4623_v53, 0.0  ;;  %v1054_v59 = vsel %vm1032_vm3, %v4624_v55, 0.0  ;;  %v1057_v62 = vsel %vm1032_vm3, %v4627_v58, 0.0  ;;  %s4599_s29 = sshll.u32 %s7775_s13, 1  ;;  %p6044_p13 = scmp.ne.s32.totalorder %s7564_s7, %s6043_s17 }
 0x243   : > { %v1060_v2 = vsel %vm1032_vm3, %v4628_v60, 0.0  ;;  %v4632_v3 = vunpack.c.h.bf16 %v7003_v61  ;;  %v1063_v5 = vsel %vm1032_vm3, %v4631_v63, 0.0  ;;  %v4635_v6 = vunpack.c.l.bf16 %v7014_v4  ;;  %s4228_s14 = sadd.s32 %s7770_s24, %s4599_s29  ;;  %s4217_s24 = scalar_lea.sflag [#allocation5], %s6868_s27 }
 0x244   : > { %5088 = vmatpush3.bf16.msra.mxu0 %v5085_v23  ;;  %v4636_v8 = vunpack.c.h.bf16 %v7014_v4  ;;  %v4639_v11 = vunpack.c.l.bf16 %v7025_v9  ;;  %v4640_v13 = vunpack.c.h.bf16 %v7025_v9  ;;  %v6229_v9 = vmov 1983009808   ;;  %s4600_s9 = sshll.u32 %s4228_s14, 7  ;;  %p6045_p1 = pnand %p6044_p13, %p7777_p3 }
 0x245   : > { %5104 = vmatpush3.bf16.msra.mxu1 %v5103_v26  ;;  %5090 = vmatprep.subr.bf16.mxu0 %v5089_v28  ;;  %v1066_v7 = vsel %vm1032_vm3, %v4632_v3, 0.0  ;;  %v1069_v10 = vsel %vm1032_vm3, %v4635_v6, 0.0  ;;  %s6235_s5 = smov [#allocation29]  }
 0x246   : > { %5108 = vmatprep.subr.bf16.mxu1 %v6223_v0  ;;  %v1072_v12 = vsel %vm1032_vm3, %v4636_v8, 0.0  ;;  %v1075_v14 = vsel %vm1032_vm3, %v4639_v11, 0.0  ;;  %v1078_v15 = vsel %vm1032_vm3, %v4640_v13, 0.0  ;;  %s7562_s1 = scalar_lea.hbm %s7776_s11, %s4600_s9  ;;  %p6046_p9 = pneg %p6045_p1 }
 0x248   : > { %4816 = vmatmul.mubr.msk.f32.vlgmr.msra.gmra.mrb[0].mxu1 %vm830_vm1, %v814_v29  ;;  %5092 = vmatpush3.bf16.msra.mxu0 %v5089_v28 }
 0x249   : > { %4829 = vmatprep.mubr.msk.f32.mxu1 %vm6224_vm0, %v6225_v1  ;;  %5105 = vmatprep.subr.bf16.mxu0 %v6223_v0 }
 0x24a   : > { %5110 = vmatpush3.bf16.msra.mxu1 %v6933_v33 }
 0x24b   : > { %4797 = vmatmul.mubr.msk.f32.vlgmr.msra.gmra.mrb[0].mxu0 %vm830_vm1, %v4608_v30  ;;  %5114 = vmatprep.subr.bf16.mxu1 %v6223_v0 }
 0x24c   : > { %4822 = vmatprep.mubr.msk.f32.mxu0 %vm6224_vm0, %v6225_v1  ;;  %5107 = vmatpush3.bf16.msra.mxu0 %v6933_v33 }
 0x24d   : > { %5111 = vmatprep.subr.bf16.mxu0 %v6223_v0 }
 0x31b   : > { %v996_v35 = vpop.f32.mrb[0].mxu1 }
 0x31c   : > { %v6939_v36 = vadd.f32 %v4532_v34, %v996_v35  ;;  %v4817_v37 = vpop.f32.mrb[1].mxu1 }
 0x31e   : > { %1293 = vrot.lane.b32.xlu1 %v6939_v36, %s6226_s19  ;;  %1289 = vrot.lane.b32.xlu0 %v6939_v36, %s6227_s25  ;;  %v4798_v16 = vpop.f32.mrb[0].mxu0 }
 0x31f   : > { %4823 = vmatmul.mubr.msk.f32.vlgmr.msra.gmra.mrb[2].mxu0 %vm1311_vm2, %v6939_v36  ;;  %v7041_v18 = vadd.f32 %v4798_v16, %v4529_v17  ;;  %v903_v19 = vpop.f32.mrb[1].mxu0 }
 0x320   : > { %5113 = vmatpush3.bf16.msra.mxu0 %v6933_v33  ;;  %4836 = vmatprep.mubr.msk.f32.mxu0 %vm6224_vm0, %v6225_v1  ;;  %v7043_v20 = vadd.f32 %v4529_v17, %v903_v19 }
 0x321   : > { %5125 = vmatprep.subr.bf16.mxu0 %v6223_v0 }
 0x322   : > { %1291 = vrot.lane.b32.xlu0 %v6939_v36, %s6228_s26  ;;  %v7047_v21 = vpack.i.bf16 %v7041_v18, %v7043_v20  ;;  %v5150_v25 = vpack.c.bf16 %v7041_v18, %v7043_v20 }
 0x341   : > { %1037 = vadd.xlane.f32.xlu0 %v1036_v42 }
 0x342   : > { %1034 = vadd.xlane.f32.xlu1 %v1033_v44 }
 0x345   : > { %1040 = vadd.xlane.f32.xlu0 %v1039_v47 }
 0x346   : > { %1043 = vadd.xlane.f32.xlu1 %v1042_v49 }
 0x349   : > { %1046 = vadd.xlane.f32.xlu0 %v1045_v52 }
 0x34a   : > { %1049 = vadd.xlane.f32.xlu1 %v1048_v54 }
 0x34d   : > { %1052 = vadd.xlane.f32.xlu0 %v1051_v57 }
 0x34e   : > { %1055 = vadd.xlane.f32.xlu1 %v1054_v59 }
 0x351   : > { %1058 = vadd.xlane.f32.xlu0 %v1057_v62 }
 0x352   : > { %1061 = vadd.xlane.f32.xlu1 %v1060_v2 }
 0x355   : > { %1064 = vadd.xlane.f32.xlu0 %v1063_v5 }
 0x356   : > { %1067 = vadd.xlane.f32.xlu1 %v1066_v7 }
 0x359   : > { %1070 = vadd.xlane.f32.xlu0 %v1069_v10 }
 0x35a   : > { %1073 = vadd.xlane.f32.xlu1 %v1072_v12 }
 0x35d   : > { %1076 = vadd.xlane.f32.xlu0 %v1075_v14 }
 0x35e   : > { %1079 = vadd.xlane.f32.xlu1 %v1078_v15 }
 0x390   : > { %v7049_v22 = vpop.permute.xlu0 %1289  ;;  %v7057_v23 = vpop.permute.xlu1 %1293 }
 0x391   : > { %4830 = vmatmul.mubr.msk.f32.vlgmr.msra.gmra.mrb[2].mxu1 %vm1311_vm2, %v7049_v22 }
 0x392   : > { %5116 = vmatpush3.bf16.msra.mxu1 %v6933_v33  ;;  %4843 = vmatprep.mubr.msk.f32.mxu1 %vm6224_vm0, %v6225_v1 }
 0x393   : > { %5117 = vmatprep.subr.bf16.mxu1 %v6223_v0 }
 0x394   : > { %v7059_v24 = vpop.permute.xlu0 %1291 }
 0x395   : > { %4837 = vmatmul.mubr.msk.f32.vlgmr.msra.gmra.mrb[4].mxu0 %vm1311_vm2, %v7059_v24  ;;  %4844 = vmatmul.mubr.msk.f32.vlgmr.msra.gmra.mrb[4].mxu1 %vm1311_vm2, %v7057_v23 }
 0x396   : > { %4850 = vmatprep.mubr.msk.f32.mxu1 %vm6224_vm0, %v6225_v1  ;;  %4864 = vmatprep.mubr.msk.f32.mxu0 %vm6224_vm0, %v6225_v1 }
 0x3ce   : > { %v1038_v26 = vpop.xlane.xlu0 %1037 }
 0x3cf   : > { %v1083_v28 = vmul.f32 0.03125, %v1038_v26  ;;  %v1035_v30 = vpop.xlane.xlu1 %1034 }
 0x3d0   : > { %v1082_v31 = vmul.f32 0.03125, %v1035_v30 }
 0x3d1   : > { %v7073_v32 = vsub.f32 %v4612_v39, %v1083_v28 }
 0x3d2   : > { %v7077_v33 = vsub.f32 %v4611_v40, %v1082_v31  ;;  %v1041_v34 = vpop.xlane.xlu0 %1040 }
 0x3d3   : > { %v1044_v35 = vpop.xlane.xlu1 %1043  ;;  %v1084_v37 = vmul.f32 0.03125, %v1041_v34  ;;  %v1115_v42 = vmul.f32 %v7073_v32, %v7073_v32 }
 0x3d4   : > { %v1085_v44 = vmul.f32 0.03125, %v1044_v35  ;;  %v1114_v47 = vmul.f32 %v7077_v33, %v7077_v33 }
 0x3d5   : > { %v7085_v49 = vsub.f32 %v4615_v43, %v1084_v37  ;;  %v1133_v39 = vsel %vm1032_vm3, %v1115_v42, 0.0 }
 0x3d6   : > { %v7090_v38 = vsub.f32 %v4616_v45, %v1085_v44  ;;  %1134 = vadd.xlane.f32.xlu1 %v1133_v39  ;;  %v1130_v40 = vsel %vm1032_vm3, %v1114_v47, 0.0  ;;  %v1047_v52 = vpop.xlane.xlu0 %1046 }
 0x3d7   : > { %v1050_v54 = vpop.xlane.xlu1 %1049  ;;  %1131 = vadd.xlane.f32.xlu0 %v1130_v40  ;;  %v1086_v57 = vmul.f32 0.03125, %v1047_v52  ;;  %v1116_v59 = vmul.f32 %v7085_v49, %v7085_v49 }
 0x3d8   : > { %v1087_v62 = vmul.f32 0.03125, %v1050_v54  ;;  %v1117_v43 = vmul.f32 %v7090_v38, %v7090_v38 }
 0x3d9   : > { %v7099_v2 = vsub.f32 %v4619_v48, %v1086_v57  ;;  %v1136_v41 = vsel %vm1032_vm3, %v1116_v59, 0.0 }
 0x3da   : > { %v7104_v45 = vsub.f32 %v4620_v50, %v1087_v62  ;;  %v1139_v5 = vsel %vm1032_vm3, %v1117_v43, 0.0  ;;  %v1053_v7 = vpop.xlane.xlu0 %1052 }
 0x3db   : > { %v1056_v10 = vpop.xlane.xlu1 %1055  ;;  %1140 = vadd.xlane.f32.xlu1 %v1139_v5  ;;  %1137 = vadd.xlane.f32.xlu0 %v1136_v41  ;;  %v1088_v12 = vmul.f32 0.03125, %v1053_v7  ;;  %v1118_v14 = vmul.f32 %v7099_v2, %v7099_v2 }
 0x3dc   : > { %v1089_v15 = vmul.f32 0.03125, %v1056_v10  ;;  %v1119_v48 = vmul.f32 %v7104_v45, %v7104_v45 }
 0x3dd   : > { %v7113_v16 = vsub.f32 %v4623_v53, %v1088_v12  ;;  %v1142_v46 = vsel %vm1032_vm3, %v1118_v14, 0.0 }
 0x3de   : > { %v7118_v50 = vsub.f32 %v4624_v55, %v1089_v15  ;;  %v1145_v17 = vsel %vm1032_vm3, %v1119_v48, 0.0  ;;  %v1059_v19 = vpop.xlane.xlu0 %1058 }
 0x3df   : > { %v1062_v26 = vpop.xlane.xlu1 %1061  ;;  %1146 = vadd.xlane.f32.xlu1 %v1145_v17  ;;  %1143 = vadd.xlane.f32.xlu0 %v1142_v46  ;;  %v1090_v28 = vmul.f32 0.03125, %v1059_v19  ;;  %v1120_v30 = vmul.f32 %v7113_v16, %v7113_v16 }
 0x3e0   : > { %v1091_v31 = vmul.f32 0.03125, %v1062_v26  ;;  %v1121_v53 = vmul.f32 %v7118_v50, %v7118_v50 }
 0x3e1   : > { %v7127_v34 = vsub.f32 %v4627_v58, %v1090_v28  ;;  %v1148_v51 = vsel %vm1032_vm3, %v1120_v30, 0.0 }
 0x3e2   : > { %v7132_v55 = vsub.f32 %v4628_v60, %v1091_v31  ;;  %v1151_v35 = vsel %vm1032_vm3, %v1121_v53, 0.0  ;;  %v1065_v37 = vpop.xlane.xlu0 %1064  ;;  %v1605_v31 = vlaneseq }
 0x3e3   : > { %v1068_v42 = vpop.xlane.xlu1 %1067  ;;  %1152 = vadd.xlane.f32.xlu1 %v1151_v35  ;;  %1149 = vadd.xlane.f32.xlu0 %v1148_v51  ;;  %v1092_v44 = vmul.f32 0.03125, %v1065_v37  ;;  %v1122_v47 = vmul.f32 %v7127_v34, %v7127_v34 }
 0x3e4   : > { %v1093_v39 = vmul.f32 0.03125, %v1068_v42  ;;  %v1123_v58 = vmul.f32 %v7132_v55, %v7132_v55 }
 0x3e5   : > { %v7141_v40 = vsub.f32 %v4631_v63, %v1092_v44  ;;  %v1154_v56 = vsel %vm1032_vm3, %v1122_v47, 0.0  ;;  %v7189_v44 = vshrl.u32 %v1605_v31, 7 }
 0x3e6   : > { %v7146_v60 = vsub.f32 %v4632_v3, %v1093_v39  ;;  %v1157_v52 = vsel %vm1032_vm3, %v1123_v58, 0.0  ;;  %v1071_v54 = vpop.xlane.xlu0 %1070 }
 0x3e7   : > { %v1074_v57 = vpop.xlane.xlu1 %1073  ;;  %1158 = vadd.xlane.f32.xlu1 %v1157_v52  ;;  %1155 = vadd.xlane.f32.xlu0 %v1154_v56  ;;  %v1094_v59 = vmul.f32 0.03125, %v1071_v54  ;;  %v1124_v62 = vmul.f32 %v7141_v40, %v7141_v40 }
 0x3e8   : > { %v1095_v43 = vmul.f32 0.03125, %v1074_v57  ;;  %v1125_v63 = vmul.f32 %v7146_v60, %v7146_v60 }
 0x3e9   : > { %v7155_v41 = vsub.f32 %v4635_v6, %v1094_v59  ;;  %v1160_v61 = vsel %vm1032_vm3, %v1124_v62, 0.0 }
 0x3ea   : > { %v7160_v3 = vsub.f32 %v4636_v8, %v1095_v43  ;;  %v1163_v5 = vsel %vm1032_vm3, %v1125_v63, 0.0  ;;  %v1077_v7 = vpop.xlane.xlu0 %1076 }
 0x3eb   : > { %v1080_v10 = vpop.xlane.xlu1 %1079  ;;  %1164 = vadd.xlane.f32.xlu1 %v1163_v5  ;;  %1161 = vadd.xlane.f32.xlu0 %v1160_v61  ;;  %v1096_v12 = vmul.f32 0.03125, %v1077_v7  ;;  %v1126_v14 = vmul.f32 %v7155_v41, %v7155_v41 }
 0x3ec   : > { %v1097_v15 = vmul.f32 0.03125, %v1080_v10  ;;  %v1127_v6 = vmul.f32 %v7160_v3, %v7160_v3 }
 0x3ed   : > { %v7169_v48 = vsub.f32 %v4639_v11, %v1096_v12  ;;  %v1166_v4 = vsel %vm1032_vm3, %v1126_v14, 0.0 }
 0x3ee   : > { %v7174_v8 = vsub.f32 %v4640_v13, %v1097_v15  ;;  %v1169_v46 = vsel %vm1032_vm3, %v1127_v6, 0.0  ;;  %v1603_v13 = vunpack.c.l.s4 %v6229_v9 }
 0x3ef   : > { %1170 = vadd.xlane.f32.xlu1 %v1169_v46  ;;  %1167 = vadd.xlane.f32.xlu0 %v1166_v4  ;;  %v1128_v17 = vmul.f32 %v7169_v48, %v7169_v48 }
 0x3f0   : > { %v1129_v19 = vmul.f32 %v7174_v8, %v7174_v8  ;;  %v1604_v42 = vunpack.c.0.s8 %v1603_v13 }
 0x3f1   : > { %v1172_v26 = vsel %vm1032_vm3, %v1128_v17, 0.0 }
 0x3f2   : > { %v1380_v11 = vpop.f32.mrb[2].mxu0  ;;  %v1175_v28 = vsel %vm1032_vm3, %v1129_v19, 0.0  ;;  %v7192_v57 = vsub.s32 %v1604_v42, %v7189_v44 }
 0x3f3   : > { %v4824_v30 = vpop.f32.mrb[3].mxu0  ;;  %1176 = vadd.xlane.f32.xlu1 %v1175_v28  ;;  %1173 = vadd.xlane.f32.xlu0 %v1172_v26 }
 0x404   : > { %5510 = vrot.lane.b32.xlu1 %v7047_v21, %s6228_s26 }
 0x408   : > { %5515 = vrot.lane.b32.xlu1 %v7047_v21, %s6226_s19  ;;  %s6047_s19 = sshll.u32 %s6235_s5, 4  ;;  %s6048_s19 = int_to_ptr.vmem [resolvable:$false] %s6047_s19 }
 0x409   : > { %5505 = vrot.lane.b32.xlu0 %v7047_v21, %s6227_s25  ;;  %s6049_s25 = scalar_lea.vmem %s6048_s19, 256  ;;  %p6050_p0 = scmp.lt.s32.totalorder %s7564_s7, %s6048_s19 }
 0x40a   : > { %p6051_p7 = scmp.lt.s32.totalorder %s6049_s25, %s6043_s17 }
 0x40c   : > { %p6052_p5 = por %p6051_p7, %p6050_p0 }
 0x40e   : > { %p6053_p4 = pnand %p6052_p5, %p6046_p9 }
 0x463   : > { %v1135_v53 = vpop.xlane.xlu1 %1134 }
 0x464   : > { %v1179_v51 = vmul.f32 0.03125, %v1135_v53  ;;  %v1132_v35 = vpop.xlane.xlu0 %1131  ;;  %v1452_v37 = vpop.f32.mrb[2].mxu1 }
 0x465   : > { %v1178_v47 = vmul.f32 0.03125, %v1132_v35  ;;  %v4831_v39 = vpop.f32.mrb[3].mxu1 }
 0x466   : > { %v1195_v58 = vadd.f32 1e-05, %v1179_v51 }
 0x467   : > { %v1194_v56 = vadd.f32 1e-05, %v1178_v47 }
 0x468   : > { %5539 = vrsqrt.f32 %v1195_v58  ;;  %v1141_v52 = vpop.xlane.xlu1 %1140  ;;  %v1138_v54 = vpop.xlane.xlu0 %1137 }
 0x469   : > { %5541 = vrsqrt.f32 %v1194_v56  ;;  %v1181_v59 = vmul.f32 0.03125, %v1141_v52  ;;  %v1180_v62 = vmul.f32 0.03125, %v1138_v54  ;;  %v1524_v43 = vpop.f32.mrb[4].mxu0  ;;  %v1596_v63 = vpop.f32.mrb[4].mxu1  ;;  %v7214_v56 = vld [vmem:[#allocation15] ss:$0 sm:$0xff] }
 0x46a   : > { %v1600_v61 = vcombine.low %v1380_v11, %v1524_v43  ;;  %v1601_v5 = vcombine.high %v1380_v11, %v1524_v43  ;;  %v1616_v7 = vcombine.low %v1452_v37, %v1596_v63  ;;  %v1617_v10 = vcombine.high %v1452_v37, %v1596_v63  ;;  %v4838_v12 = vpop.f32.mrb[5].mxu0  ;;  %v4845_v14 = vpop.f32.mrb[5].mxu1 }
 0x46b   : > { %v1197_v15 = vadd.f32 1e-05, %v1181_v59  ;;  %v1196_v6 = vadd.f32 1e-05, %v1180_v62  ;;  %v6230_v63 = vmov 1934713408  }
 0x46c   : > { %v7195_v4 = vrot.slane %v1600_v61, %v7192_v57  ;;  %v7198_v46 = vrot.slane %v1601_v5, %v7192_v57  ;;  %v7201_v17 = vrot.slane %v1616_v7, %v7192_v57  ;;  %v7204_v19 = vrot.slane %v1617_v10, %v7192_v57  ;;  %v1147_v26 = vpop.xlane.xlu1 %1146  ;;  %v1144_v11 = vpop.xlane.xlu0 %1143  ;;  %v7218_v10 = vld [vmem:[#allocation17] ss:$0 sm:$0xff] }
 0x46d   : > { %5543 = vrsqrt.f32 %v1197_v15  ;;  %v1183_v28 = vmul.f32 0.03125, %v1147_v26  ;;  %v1182_v30 = vmul.f32 0.03125, %v1144_v11  ;;  %v1635_v61 = vunpack.c.l.s4 %v6230_v63 }
 0x46e   : > { %5545 = vrsqrt.f32 %v1196_v6  ;;  %v1632_v9 = vcombine.low %v7195_v4, %v7201_v17  ;;  %v1633_v13 = vcombine.high %v7195_v4, %v7201_v17  ;;  %v1648_v31 = vcombine.low %v7198_v46, %v7204_v19 }
 0x46f   : > { %v1649_v53 = vcombine.high %v7198_v46, %v7204_v19  ;;  %v1199_v51 = vadd.f32 1e-05, %v1183_v28  ;;  %v1198_v35 = vadd.f32 1e-05, %v1182_v30 }
 0x470   : > { %v1153_v37 = vpop.xlane.xlu1 %1152  ;;  %v1150_v42 = vpop.xlane.xlu0 %1149 }
 0x471   : > { %5547 = vrsqrt.f32 %v1199_v51  ;;  %v1185_v47 = vmul.f32 0.03125, %v1153_v37  ;;  %v1184_v39 = vmul.f32 0.03125, %v1150_v42  ;;  %v1636_v51 = vunpack.c.0.s8 %v1635_v61 }
 0x472   : > { %v5540_v58 = vpop.eup %5539  ;;  %5549 = vrsqrt.f32 %v1198_v35 }
 0x473   : > { %v5542_v52 = vpop.eup %5541  ;;  %v1227_v54 = vmul.f32 %v5540_v58, %v7073_v32  ;;  %v1201_v59 = vadd.f32 1e-05, %v1185_v47  ;;  %v1200_v62 = vadd.f32 1e-05, %v1184_v39  ;;  %v7237_v61 = vsub.s32 %v1636_v51, %v7189_v44 }
 0x474   : > { %v1226_v43 = vmul.f32 %v5542_v52, %v7077_v33  ;;  %v1159_v5 = vpop.xlane.xlu1 %1158  ;;  %v1156_v7 = vpop.xlane.xlu0 %1155 }
 0x475   : > { %v1250_v12 = vmul.f32 %v7214_v56, %v1227_v54  ;;  %5551 = vrsqrt.f32 %v1201_v59  ;;  %v1187_v14 = vmul.f32 0.03125, %v1159_v5  ;;  %v1186_v15 = vmul.f32 0.03125, %v1156_v7 }
 0x476   : > { %v1249_v6 = vmul.f32 %v7214_v56, %v1226_v43  ;;  %5553 = vrsqrt.f32 %v1200_v62 }
 0x477   : > { %v5544_v26 = vpop.eup %5543  ;;  %v1203_v32 = vadd.f32 1e-05, %v1187_v14  ;;  %v1202_v11 = vadd.f32 1e-05, %v1186_v15  ;;  %v1273_v28 = vadd.f32 %v7218_v10, %v1250_v12 }
 0x478   : > { %v5546_v33 = vpop.eup %5545  ;;  %v1229_v30 = vmul.f32 %v5544_v26, %v7090_v38  ;;  %v1165_v35 = vpop.xlane.xlu1 %1164  ;;  %v1272_v42 = vadd.f32 %v7218_v10, %v1249_v6 }
 0x479   : > { %v1162_v37 = vpop.xlane.xlu0 %1161  ;;  %v1228_v47 = vmul.f32 %v5546_v33, %v7085_v49  ;;  %5555 = vrsqrt.f32 %v1203_v32  ;;  %v1189_v39 = vmul.f32 0.03125, %v1165_v35 }
 0x47a   : > { %v1188_v58 = vmul.f32 0.03125, %v1162_v37  ;;  %v1252_v54 = vmul.f32 %v7214_v56, %v1229_v30  ;;  %5557 = vrsqrt.f32 %v1202_v11  ;;  %v7233_v38 = vpack.c.bf16 %v1273_v28, %v1272_v42 }
 0x47b   : > { %v5548_v59 = vpop.eup %5547  ;;  %v1251_v62 = vmul.f32 %v7214_v56, %v1228_v47  ;;  %v1205_v43 = vadd.f32 1e-05, %v1189_v39 }
 0x47c   : > { %v1204_v63 = vadd.f32 1e-05, %v1188_v58  ;;  %v5550_v49 = vpop.eup %5549  ;;  %v1231_v5 = vmul.f32 %v5548_v59, %v7104_v45  ;;  %v1171_v7 = vpop.xlane.xlu1 %1170  ;;  %5120 = vmatpush3.bf16.xpose.msk.msra.mxu1 %vm7228_vm4, %v7233_v38  ;;  %v1275_v45 = vadd.f32 %v7218_v10, %v1252_v54 }
 0x47d   : > { %v1168_v12 = vpop.xlane.xlu0 %1167  ;;  %v1230_v14 = vmul.f32 %v5550_v49, %v7099_v2  ;;  %5559 = vrsqrt.f32 %v1205_v43  ;;  %v1191_v15 = vmul.f32 0.03125, %v1171_v7  ;;  %5121 = vmatprep.subr.bf16.mxu1 %v6223_v0  ;;  %v1274_v44 = vadd.f32 %v7218_v10, %v1251_v62 }
 0x47e   : > { %v1190_v6 = vmul.f32 0.03125, %v1168_v12  ;;  %v1254_v26 = vmul.f32 %v7214_v56, %v1231_v5  ;;  %5561 = vrsqrt.f32 %v1204_v63  ;;  %v1640_v2 = vrot.slane %v1632_v9, %v7237_v61 }
 0x47f   : > { %v5552_v32 = vpop.eup %5551  ;;  %v1253_v11 = vmul.f32 %v7214_v56, %v1230_v14  ;;  %v1207_v28 = vadd.f32 1e-05, %v1191_v15  ;;  %v7257_v59 = vpack.c.bf16 %v1275_v45, %v1274_v44 }
 0x480   : > { %v1206_v33 = vadd.f32 1e-05, %v1190_v6  ;;  %v5554_v30 = vpop.eup %5553  ;;  %v1233_v51 = vmul.f32 %v5552_v32, %v7118_v50  ;;  %v1177_v35 = vpop.xlane.xlu1 %1176  ;;  %v1277_v42 = vadd.f32 %v7218_v10, %v1254_v26 }
 0x481   : > { %v1174_v37 = vpop.xlane.xlu0 %1173  ;;  %v1232_v47 = vmul.f32 %v5554_v30, %v7113_v16  ;;  %5563 = vrsqrt.f32 %v1207_v28  ;;  %v1193_v39 = vmul.f32 0.03125, %v1177_v35  ;;  %v1276_v62 = vadd.f32 %v7218_v10, %v1253_v11 }
 0x482   : > { %v1192_v58 = vmul.f32 0.03125, %v1174_v37  ;;  %v1256_v54 = vmul.f32 %v7214_v56, %v1233_v51  ;;  %5565 = vrsqrt.f32 %v1206_v33  ;;  %v1664_v35 = vcombine.high %v1640_v2, %v6225_v1 }
 0x483   : > { %v5556_v43 = vpop.eup %5555  ;;  %v1255_v9 = vmul.f32 %v7214_v56, %v1232_v47  ;;  %v1209_v50 = vadd.f32 1e-05, %v1193_v39  ;;  %4851 = vmatmul.mubr.msk.f32.vlgmr.msra.gmra.mrb[6].mxu1 %vm1032_vm3, %v1640_v2  ;;  %v7266_v5 = vpack.c.bf16 %v1277_v42, %v1276_v62 }
 0x484   : > { %v1208_v63 = vadd.f32 1e-05, %v1192_v58  ;;  %v5558_v49 = vpop.eup %5557  ;;  %v1235_v16 = vmul.f32 %v5556_v43, %v7132_v55  ;;  %5124 = vmatpush3.bf16.xpose.msk.msra.mxu1 %vm7228_vm4, %v7257_v59  ;;  %4857 = vmatprep.mubr.msk.f32.mxu1 %vm6224_vm0, %v6225_v1  ;;  %v1279_v7 = vadd.f32 %v7218_v10, %v1256_v54  ;;  %v7271_v12 = vpop.permute.xlu1 %5510 }
 0x485   : > { %v7273_v14 = vpop.permute.xlu0 %5505  ;;  %v1234_v15 = vmul.f32 %v5558_v49, %v7127_v34  ;;  %5567 = vrsqrt.f32 %v1209_v50  ;;  %5129 = vmatprep.subr.bf16.mxu1 %v6223_v0  ;;  %v1278_v55 = vadd.f32 %v7218_v10, %v1255_v9  ;;  %v5513_v6 = vunpack.i.h.bf16 %v7271_v12  ;;  %5128 = vmatpush3.bf16.xpose.msk.msra.mxu0 %vm7228_vm4, %v7266_v5 }
 0x486   : > { %v1258_v26 = vmul.f32 %v7214_v56, %v1235_v16  ;;  %5569 = vrsqrt.f32 %v1208_v63  ;;  %v5512_v44 = vunpack.i.l.bf16 %v7271_v12  ;;  %v5508_v45 = vunpack.i.h.bf16 %v7273_v14  ;;  %5133 = vmatprep.subr.bf16.mxu0 %v6223_v0 }
 0x487   : > { %v5560_v32 = vpop.eup %5559  ;;  %v1257_v34 = vmul.f32 %v7214_v56, %v1234_v15  ;;  %v5507_v11 = vunpack.i.l.bf16 %v7273_v14  ;;  %v7296_v39 = vpack.c.bf16 %v1279_v7, %v1278_v55 }
 0x488   : > { %v5562_v28 = vpop.eup %5561  ;;  %v1237_v33 = vmul.f32 %v5560_v32, %v7146_v60  ;;  %v1281_v30 = vadd.f32 %v7218_v10, %v1258_v26  ;;  %v7290_v51 = vpop.permute.xlu1 %5515  ;;  %v1647_v60 = vrot.slane %v1633_v13, %v7237_v61  ;;  %v5158_v18 = vpack.c.bf16 %v5513_v6, %v5512_v44 }
 0x489   : > { %v1236_v37 = vmul.f32 %v5562_v28, %v7141_v40  ;;  %v1280_v42 = vadd.f32 %v7218_v10, %v1257_v34  ;;  %v5518_v58 = vunpack.i.h.bf16 %v7290_v51  ;;  %v5517_v54 = vunpack.i.l.bf16 %v7290_v51 }
 0x48a   : > { %v1260_v47 = vmul.f32 %v7214_v56, %v1237_v33  ;;  %v1665_v7 = vcombine.high %v1647_v60, %v6225_v1  ;;  %v1656_v34 = vrot.slane %v1648_v31, %v7237_v61  ;;  %v5154_v46 = vpack.c.bf16 %v5508_v45, %v5507_v11 }
 0x48b   : > { %v5564_v62 = vpop.eup %5563  ;;  %v1259_v2 = vmul.f32 %v7214_v56, %v1236_v37  ;;  %4858 = vmatmul.mubr.msk.f32.vlgmr.msra.gmra.mrb[8].mxu1 %vm1032_vm3, %v1664_v35  ;;  %v7306_v40 = vpack.c.bf16 %v1281_v30, %v1280_v42  ;;  %v1663_v30 = vrot.slane %v1649_v53, %v7237_v61  ;;  %v5162_v20 = vpack.c.bf16 %v5518_v58, %v5517_v54  ;;  %v4576_v35 = vld [vmem:[%s693_s28] ss:$0 sm:$0xff] }
 0x48c   : > { %v5566_v43 = vpop.eup %5565  ;;  %v1239_v9 = vmul.f32 %v5564_v62, %v7160_v3  ;;  %5132 = vmatpush3.bf16.xpose.msk.msra.mxu1 %vm7228_vm4, %v7296_v39  ;;  %4871 = vmatprep.mubr.msk.f32.mxu1 %vm6224_vm0, %v6225_v1  ;;  %v1283_v17 = vadd.f32 %v7218_v10, %v1260_v47 }
 0x48d   : > { %v1238_v50 = vmul.f32 %v5566_v43, %v7155_v41  ;;  %4865 = vmatmul.mubr.msk.f32.vlgmr.msra.gmra.mrb[6].mxu0 %vm1032_vm3, %v1647_v60  ;;  %5137 = vmatprep.subr.bf16.mxu1 %v6223_v0  ;;  %v1282_v3 = vadd.f32 %v7218_v10, %v1259_v2  ;;  %v1667_v19 = vcombine.high %v1663_v30, %v6225_v1 }
 0x48e   : > { %v1262_v4 = vmul.f32 %v7214_v56, %v1239_v9  ;;  %5136 = vmatpush3.bf16.xpose.msk.msra.mxu0 %vm7228_vm4, %v7306_v40  ;;  %4878 = vmatprep.mubr.msk.f32.mxu0 %vm6224_vm0, %v6225_v1 }
 0x48f   : > { %v5568_v13 = vpop.eup %5567  ;;  %v1261_v41 = vmul.f32 %v7214_v56, %v1238_v50  ;;  %5141 = vmatprep.subr.bf16.mxu0 %v6223_v0  ;;  %v7333_v32 = vpack.c.bf16 %v1283_v17, %v1282_v3 }
 0x490   : > { %v5570_v63 = vpop.eup %5569  ;;  %v1241_v49 = vmul.f32 %v5568_v13, %v7174_v8  ;;  %v1285_v16 = vadd.f32 %v7218_v10, %v1262_v4 }
 0x491   : > { %v1240_v15 = vmul.f32 %v5570_v63, %v7169_v48  ;;  %v1284_v55 = vadd.f32 %v7218_v10, %v1261_v41 }
 0x492   : > { %v1264_v26 = vmul.f32 %v7214_v56, %v1241_v49 }
 0x493   : > { %v1263_v28 = vmul.f32 %v7214_v56, %v1240_v15  ;;  %4872 = vmatmul.mubr.msk.f32.vlgmr.msra.gmra.mrb[10].mxu1 %vm1032_vm3, %v1665_v7  ;;  %v7341_v8 = vpack.c.bf16 %v1285_v16, %v1284_v55  ;;  %v1666_v56 = vcombine.high %v1656_v34, %v6225_v1 }
 0x494   : > { %5140 = vmatpush3.bf16.xpose.msk.msra.mxu1 %vm7228_vm4, %v7333_v32  ;;  %4885 = vmatprep.mubr.msk.f32.mxu1 %vm6224_vm0, %v6225_v1  ;;  %v1287_v31 = vadd.f32 %v7218_v10, %v1264_v26 }
 0x495   : > { %4879 = vmatmul.mubr.msk.f32.vlgmr.msra.gmra.mrb[8].mxu0 %vm1032_vm3, %v1656_v34  ;;  %5145 = vmatprep.subr.bf16.mxu1 %v6223_v0  ;;  %v1286_v48 = vadd.f32 %v7218_v10, %v1263_v28 }
 0x496   : > { %5144 = vmatpush3.bf16.xpose.msk.msra.mxu0 %vm7228_vm4, %v7341_v8  ;;  %4892 = vmatprep.mubr.msk.f32.mxu0 %vm6224_vm0, %v6225_v1 }
 0x497   : > { %5149 = vmatprep.subr.bf16.mxu0 %v6223_v0  ;;  %v7359_v33 = vpack.c.bf16 %v1287_v31, %v1286_v48 }
 0x49b   : > { %4886 = vmatmul.mubr.msk.f32.vlgmr.msra.gmra.mrb[12].mxu1 %vm1032_vm3, %v1666_v56 }
 0x49c   : > { %5148 = vmatpush3.bf16.xpose.msk.msra.mxu1 %vm7228_vm4, %v7359_v33  ;;  %4899 = vmatprep.mubr.msk.f32.mxu1 %vm6224_vm0, %v6225_v1 }
 0x49d   : > { %4893 = vmatmul.mubr.msk.f32.vlgmr.msra.gmra.mrb[10].mxu0 %vm1032_vm3, %v1663_v30  ;;  %5153 = vmatprep.subr.bf16.mxu1 %v6223_v0 }
 0x49e   : > { %5152 = vmatpush3.bf16.xpose.msk.msra.mxu0 %vm7368_vm5, %v5150_v25  ;;  %4906 = vmatprep.mubr.msk.f32.mxu0 %vm6224_vm0, %v6225_v1 }
 0x49f   : > { %5157 = vmatprep.subr.bf16.mxu0 %v6223_v0 }
 0x4a3   : > { %4900 = vmatmul.mubr.msk.f32.vlgmr.msra.gmra.mrb[14].mxu1 %vm1032_vm3, %v1667_v19 }
 0x4a4   : > { %5156 = vmatpush3.bf16.xpose.msk.msra.mxu1 %vm7368_vm5, %v5154_v46  ;;  %4913 = vmatprep.mubr.msk.f32.mxu1 %vm6224_vm0, %v6225_v1 }
 0x4a5   : > { %4907 = vmatmul.mubr.msk.f32.vlgmr.msra.gmra.mrb[12].mxu0 %vm1311_vm2, %v6939_v36  ;;  %5161 = vmatprep.subr.bf16.mxu1 %v6223_v0 }
 0x4a6   : > { %5160 = vmatpush3.bf16.xpose.msk.msra.mxu0 %vm7368_vm5, %v5158_v18  ;;  %4920 = vmatprep.mubr.msk.f32.mxu0 %vm6224_vm0, %v6225_v1 }
 0x4a7   : > { %5165 = vmatprep.subr.bf16.mxu0 %v6223_v0 }
 0x4ab   : > { %4914 = vmatmul.mubr.msk.f32.vlgmr.msra.gmra.mrb[16].mxu1 %vm1311_vm2, %v7049_v22 }
 0x4ac   : > { %5164 = vmatpush3.bf16.xpose.msk.msra.mxu1 %vm7368_vm5, %v5162_v20  ;;  %4927 = vmatprep.mubr.msk.f32.mxu1 %vm6224_vm0, %v6225_v1 }
 0x4ad   : > { %4921 = vmatmul.mubr.msk.f32.vlgmr.msra.gmra.mrb[14].mxu0 %vm1311_vm2, %v7059_v24  ;;  %5168 = vmatprep.subr.bf16.mxu1 %v6223_v0 }
 0x4ae   : > { %4934 = vmatprep.mubr.msk.f32.mxu0 %vm6224_vm0, %v6225_v1 }
 0x4b3   : > { %4928 = vmatmul.mubr.msk.f32.vlgmr.msra.gmra.mrb[18].mxu1 %vm1311_vm2, %v7057_v23 }
 0x4b4   : > { %4941 = vmatprep.mubr.msk.f32.mxu1 %vm6224_vm0, %v6225_v1 }
 0x556   : > { %v1743_v36 = vpop.f32.mrb[6].mxu1 }
 0x557   : > { %v4852_v22 = vpop.f32.mrb[7].mxu1 }
 0x55e   : > { %v1822_v25 = vpop.f32.mrb[8].mxu1 }
 0x55f   : > { %v4859_v53 = vpop.f32.mrb[9].mxu1 }
 0x560   : > { %v1901_v10 = vpop.f32.mrb[6].mxu0 }
 0x561   : > { %v2300_v52 = vcombine.low %v1743_v36, %v1901_v10  ;;  %v4866_v6 = vpop.f32.mrb[7].mxu0 }
 0x563   : > { %v2307_v37 = vrot.slane %v2300_v52, %v7192_v57 }
 0x566   : > { %v1980_v44 = vpop.f32.mrb[10].mxu1 }
 0x567   : > { %v2308_v24 = vcombine.low %v1822_v25, %v1980_v44  ;;  %v4873_v45 = vpop.f32.mrb[11].mxu1 }
 0x568   : > { %v2059_v11 = vpop.f32.mrb[8].mxu0 }
 0x569   : > { %v2315_v42 = vrot.slane %v2308_v24, %v7192_v57  ;;  %v4880_v47 = vpop.f32.mrb[9].mxu0 }
 0x56b   : > { %v2332_v23 = vcombine.low %v2307_v37, %v2315_v42  ;;  %v2333_v58 = vcombine.high %v2307_v37, %v2315_v42 }
 0x56d   : > { %v2340_v16 = vrot.slane %v2332_v23, %v7237_v61  ;;  %v2347_v15 = vrot.slane %v2333_v58, %v7237_v61 }
 0x56e   : > { %v2138_v54 = vpop.f32.mrb[12].mxu1 }
 0x56f   : > { %v4887_v62 = vpop.f32.mrb[13].mxu1 }
 0x570   : > { %v2217_v60 = vpop.f32.mrb[10].mxu0 }
 0x571   : > { %v2316_v2 = vcombine.low %v2059_v11, %v2217_v60  ;;  %v4894_v43 = vpop.f32.mrb[11].mxu0 }
 0x573   : > { %v2323_v17 = vrot.slane %v2316_v2, %v7192_v57 }
 0x576   : > { %v2296_v9 = vpop.f32.mrb[14].mxu1 }
 0x577   : > { %v2324_v50 = vcombine.low %v2138_v54, %v2296_v9  ;;  %v4901_v4 = vpop.f32.mrb[15].mxu1 }
 0x578   : > { %v2438_v3 = vpop.f32.mrb[12].mxu0 }
 0x579   : > { %v2331_v13 = vrot.slane %v2324_v50, %v7192_v57  ;;  %v4908_v41 = vpop.f32.mrb[13].mxu0 }
 0x57b   : > { %v2348_v63 = vcombine.low %v2323_v17, %v2331_v13  ;;  %v2349_v49 = vcombine.high %v2323_v17, %v2331_v13 }
 0x57d   : > { %v2356_v7 = vrot.slane %v2348_v63, %v7237_v61  ;;  %v2363_v55 = vrot.slane %v2349_v49, %v7237_v61 }
 0x57e   : > { %v2512_v26 = vpop.f32.mrb[16].mxu1 }
 0x57f   : > { %v2364_v34 = vcombine.low %v2340_v16, %v2356_v7  ;;  %v2365_v28 = vcombine.high %v2340_v16, %v2356_v7  ;;  %v2366_v48 = vcombine.low %v2347_v15, %v2363_v55  ;;  %v4915_v31 = vpop.f32.mrb[17].mxu1  ;;  %v2367_v56 = vcombine.high %v2347_v15, %v2363_v55 }
 0x580   : > { %v2586_v30 = vpop.f32.mrb[14].mxu0 }
 0x581   : > { %v2439_v46 = vadd.f32 %v2438_v3, %v2364_v34  ;;  %v2513_v19 = vadd.f32 %v2512_v26, %v2365_v28  ;;  %v2587_v18 = vadd.f32 %v2586_v30, %v2366_v48  ;;  %v4922_v20 = vpop.f32.mrb[15].mxu0 }
 0x583   : > { %v2672_v36 = vadd.f32 %v4576_v35, %v2513_v19  ;;  %v2671_v22 = vadd.f32 %v4576_v35, %v2439_v46  ;;  %v2673_v10 = vadd.f32 %v4576_v35, %v2587_v18 }
 0x585   : > { %v2678_v25 = vsel %vm1311_vm2, %v2672_v36, -inf  ;;  %v2675_v53 = vsel %vm1311_vm2, %v2671_v22, -inf  ;;  %v2681_v24 = vsel %vm1311_vm2, %v2673_v10, -inf }
 0x586   : > { %2679 = vmax.xlane.f32.xlu1 %v2678_v25  ;;  %v2660_v52 = vpop.f32.mrb[18].mxu1  ;;  %2676 = vmax.xlane.f32.xlu0 %v2675_v53 }
 0x587   : > { %v2661_v6 = vadd.f32 %v2660_v52, %v2367_v56  ;;  %v4929_v44 = vpop.f32.mrb[19].mxu1 }
 0x589   : > { %v2674_v45 = vadd.f32 %v4576_v35, %v2661_v6 }
 0x58a   : > { %2682 = vmax.xlane.f32.xlu0 %v2681_v24 }
 0x58b   : > { %v2684_v11 = vsel %vm1311_vm2, %v2674_v45, -inf }
 0x58e   : > { %2685 = vmax.xlane.f32.xlu0 %v2684_v11 }
 0x597   : > { %5520 = vrot.lane.b32.xlu1 %v7047_v21, %s6231_s6 }
 0x613   : > { %v2680_v37 = vpop.xlane.xlu1 %2679  ;;  %v2677_v42 = vpop.xlane.xlu0 %2676 }
 0x614   : > { %v2688_v47 = vsub.f32 %v2672_v36, %v2680_v37  ;;  %v2687_v23 = vsub.f32 %v2671_v22, %v2677_v42 }
 0x616   : > { %v2693_v58 = vmul.f32 1.442695, %v2688_v47  ;;  %v2691_v54 = vmul.f32 1.442695, %v2687_v23 }
 0x617   : > { %v5521_v62 = vpop.permute.xlu1 %5520  ;;  %v2683_v60 = vpop.xlane.xlu0 %2682 }
 0x618   : > { %5571 = vpow2.f32 %v2693_v58  ;;  %v5523_v2 = vunpack.i.h.bf16 %v5521_v62  ;;  %v5522_v43 = vunpack.i.l.bf16 %v5521_v62  ;;  %v2689_v9 = vsub.f32 %v2673_v10, %v2683_v60 }
 0x619   : > { %5573 = vpow2.f32 %v2691_v54 }
 0x61a   : > { %v5166_v50 = vpack.c.bf16 %v5523_v2, %v5522_v43  ;;  %v2695_v4 = vmul.f32 1.442695, %v2689_v9 }
 0x61b   : > { %v2686_v3 = vpop.xlane.xlu0 %2685 }
 0x61c   : > { %5575 = vpow2.f32 %v2695_v4  ;;  %v2690_v17 = vsub.f32 %v2674_v45, %v2686_v3  ;;  %5167 = vmatpush3.bf16.msra.mxu0 %v5166_v50  ;;  %v3756_v4 = vld [vmem:[#allocation20 + $0x8] sm:$0xff]  ;;  %v3757_v3 = vld [vmem:[#allocation20 + $0x10] sm:$0xff] }
 0x61d   : > { %5171 = vmatprep.subr.bf16.mxu0 %v6223_v0 }
 0x61e   : > { %v2697_v21 = vmul.f32 1.442695, %v2690_v17  ;;  %v3758_v17 = vld [vmem:[#allocation20 + $0x18] sm:$0xff] }
 0x620   : > { %5577 = vpow2.f32 %v2697_v21  ;;  %v5205_v21 = vpack.c.bf16 %v3758_v17, %v3757_v3  ;;  %v4593_v17 = vld [vmem:[#allocation21] ss:$0 sm:$0xff] }
 0x622   : > { %v5572_v13 = vpop.eup %5571 }
 0x623   : > { %v5574_v41 = vpop.eup %5573  ;;  %v2702_v63 = vsel %vm1311_vm2, %v5572_v13, 0.0 }
 0x624   : > { %v2699_v49 = vsel %vm1311_vm2, %v5574_v41, 0.0  ;;  %2703 = vadd.xlane.f32.xlu0 %v2702_v63 }
 0x625   : > { %2700 = vadd.xlane.f32.xlu1 %v2699_v49 }
 0x626   : > { %v5576_v16 = vpop.eup %5575 }
 0x627   : > { %v2705_v7 = vsel %vm1311_vm2, %v5576_v16, 0.0 }
 0x629   : > { %2706 = vadd.xlane.f32.xlu1 %v2705_v7 }
 0x62a   : > { %v5578_v15 = vpop.eup %5577 }
 0x62b   : > { %v2708_v55 = vsel %vm1311_vm2, %v5578_v15, 0.0 }
 0x62c   : > { %2709 = vadd.xlane.f32.xlu0 %v2708_v55 }
 0x63a   : > { %5530 = vrot.lane.b32.xlu1 %v7271_v12, %s6231_s6 }
 0x63e   : > { %5535 = vrot.lane.b32.xlu1 %v7290_v51, %s6231_s6 }
 0x642   : > { %5525 = vrot.lane.b32.xlu0 %v7273_v14, %s6231_s6 }
 0x6b1   : > { %v2704_v34 = vpop.xlane.xlu0 %2703 }
 0x6b2   : > { %v2701_v26 = vpop.xlane.xlu1 %2700 }
 0x6b3   : > { %5579 = vrcp.f32 %v2701_v26 }
 0x6b4   : > { %5581 = vrcp.f32 %v2704_v34 }
 0x6b6   : > { %v2707_v28 = vpop.xlane.xlu1 %2706 }
 0x6b7   : > { %5583 = vrcp.f32 %v2707_v28 }
 0x6b9   : > { %v2710_v48 = vpop.xlane.xlu0 %2709 }
 0x6ba   : > { %v5531_v31 = vpop.permute.xlu1 %5530  ;;  %5585 = vrcp.f32 %v2710_v48 }
 0x6bb   : > { %v5533_v56 = vunpack.i.h.bf16 %v5531_v31  ;;  %v5532_v30 = vunpack.i.l.bf16 %v5531_v31 }
 0x6bd   : > { %v5580_v35 = vpop.eup %5579  ;;  %v5172_v46 = vpack.c.bf16 %v5533_v56, %v5532_v30  ;;  %v5526_v12 = vpop.permute.xlu0 %5525 }
 0x6be   : > { %v2715_v19 = vmul.f32 %v5580_v35, %v5574_v41  ;;  %v5536_v18 = vpop.permute.xlu1 %5535  ;;  %v5528_v51 = vunpack.i.h.bf16 %v5526_v12  ;;  %v5527_v20 = vunpack.i.l.bf16 %v5526_v12  ;;  %v5582_v36 = vpop.eup %5581 }
 0x6bf   : > { %v5538_v14 = vunpack.i.h.bf16 %v5536_v18  ;;  %v5537_v22 = vunpack.i.l.bf16 %v5536_v18  ;;  %v2716_v52 = vmul.f32 %v5582_v36, %v5572_v13 }
 0x6c0   : > { %v5169_v25 = vpack.c.bf16 %v5528_v51, %v5527_v20  ;;  %4935 = vmatmul.mubr.msk.f32.vlgmr.msra.gmra.mrb[16].mxu0 %vm1311_vm2, %v2715_v19 }
 0x6c1   : > { %v5584_v53 = vpop.eup %5583  ;;  %5173 = vmatpush3.bf16.msra.mxu0 %v5172_v46  ;;  %4948 = vmatprep.mubr.msk.f32.mxu0 %vm6224_vm0, %v6225_v1  ;;  %v5175_v44 = vpack.c.bf16 %v5538_v14, %v5537_v22 }
 0x6c2   : > { %v2717_v10 = vmul.f32 %v5584_v53, %v5576_v16  ;;  %5170 = vmatpush3.bf16.msra.mxu1 %v5169_v25  ;;  %5177 = vmatprep.subr.bf16.mxu0 %v6223_v0 }
 0x6c3   : > { %5174 = vmatprep.subr.bf16.mxu1 %v6223_v0 }
 0x6c4   : > { %v5586_v6 = vpop.eup %5585  ;;  %4949 = vmatmul.mubr.msk.f32.vlgmr.msra.gmra.mrb[18].mxu0 %vm1311_vm2, %v2717_v10  ;;  %v3035_v24 = vcombine.low %v2715_v19, %v2717_v10  ;;  %v3036_v42 = vcombine.high %v2715_v19, %v2717_v10 }
 0x6c5   : > { %v2718_v45 = vmul.f32 %v5586_v6, %v5578_v15  ;;  %5179 = vmatpush3.bf16.msra.mxu0 %v7233_v38  ;;  %4942 = vmatmul.mubr.msk.f32.vlgmr.msra.gmra.mrb[20].mxu1 %vm1311_vm2, %v2716_v52 }
 0x6c6   : > { %5176 = vmatpush3.bf16.msra.mxu1 %v5175_v44  ;;  %4955 = vmatprep.mubr.msk.f32.mxu1 %vm6224_vm0, %v6225_v1  ;;  %v3043_v38 = vrot.slane %v3035_v24, %v7192_v57  ;;  %v3050_v60 = vrot.slane %v3036_v42, %v7192_v57 }
 0x6c7   : > { %v3051_v11 = vcombine.low %v2716_v52, %v2718_v45  ;;  %v3052_v37 = vcombine.high %v2716_v52, %v2718_v45  ;;  %5180 = vmatprep.subr.bf16.mxu1 %v6223_v0  ;;  %4962 = vmatprep.mubr.msk.f32.mxu0 %vm6224_vm0, %v6225_v1 }
 0x6c8   : > { %5183 = vmatprep.subr.bf16.mxu0 %v6223_v0 }
 0x6c9   : > { %4956 = vmatmul.mubr.msk.f32.vlgmr.msra.gmra.mrb[22].mxu1 %vm1311_vm2, %v2718_v45  ;;  %v3059_v47 = vrot.slane %v3051_v11, %v7192_v57  ;;  %v3066_v54 = vrot.slane %v3052_v37, %v7192_v57 }
 0x6ca   : > { %5182 = vmatpush3.bf16.msra.mxu1 %v7257_v59  ;;  %4969 = vmatprep.mubr.msk.f32.mxu1 %vm6224_vm0, %v6225_v1 }
 0x6cb   : > { %v3067_v23 = vcombine.low %v3043_v38, %v3059_v47  ;;  %5186 = vmatprep.subr.bf16.mxu1 %v6223_v0  ;;  %v3068_v58 = vcombine.high %v3043_v38, %v3059_v47  ;;  %v3083_v59 = vcombine.low %v3050_v60, %v3066_v54  ;;  %v3084_v50 = vcombine.high %v3050_v60, %v3066_v54  ;;  %v4097_v47 = vld [vmem:[#allocation23 + $0x10] sm:$0xff]  ;;  %v4099_v54 = vld [vmem:[#allocation23 + $0x20] sm:$0xff] }
 0x6cd   : > { %v3075_v62 = vrot.slane %v3067_v23, %v7237_v61  ;;  %v3082_v43 = vrot.slane %v3068_v58, %v7237_v61  ;;  %v4098_v23 = vld [vmem:[#allocation23 + $0x18] sm:$0xff] }
 0x6ce   : > { %v5229_v58 = vpack.c.bf16 %v4098_v23, %v4097_v47 }
 0x6cf   : > { %4963 = vmatmul.mubr.msk.f32.vlgmr.msra.gmra.mrb[20].mxu0 %vm1311_vm2, %v3075_v62  ;;  %v3099_v2 = vcombine.high %v3075_v62, %v6225_v1  ;;  %v3100_v9 = vcombine.high %v3082_v43, %v6225_v1  ;;  %v4100_v62 = vld [vmem:[#allocation23 + $0x28] sm:$0xff] }
 0x6d0   : > { %5185 = vmatpush3.bf16.msra.mxu0 %v7266_v5  ;;  %4976 = vmatprep.mubr.msk.f32.mxu0 %vm6224_vm0, %v6225_v1  ;;  %v3091_v5 = vrot.slane %v3083_v59, %v7237_v61  ;;  %v5232_v60 = vpack.c.bf16 %v4100_v62, %v4099_v54 }
 0x6d1   : > { %4970 = vmatmul.mubr.msk.f32.vlgmr.msra.gmra.mrb[24].mxu1 %vm1311_vm2, %v3099_v2  ;;  %5189 = vmatprep.subr.bf16.mxu0 %v6223_v0  ;;  %v4101_v2 = vld [vmem:[#allocation23 + $0x30] sm:$0xff] }
 0x6d2   : > { %5188 = vmatpush3.bf16.msra.mxu1 %v7296_v39  ;;  %4983 = vmatprep.mubr.msk.f32.mxu1 %vm6224_vm0, %v6225_v1  ;;  %v3101_v39 = vcombine.high %v3091_v5, %v6225_v1 }
 0x6d3   : > { %4977 = vmatmul.mubr.msk.f32.vlgmr.msra.gmra.mrb[22].mxu0 %vm1311_vm2, %v3082_v43  ;;  %5192 = vmatprep.subr.bf16.mxu1 %v6223_v0  ;;  %v4102_v43 = vld [vmem:[#allocation23 + $0x38] sm:$0xff] }
 0x6d4   : > { %5191 = vmatpush3.bf16.msra.mxu0 %v7306_v40  ;;  %4990 = vmatprep.mubr.msk.f32.mxu0 %vm6224_vm0, %v6225_v1  ;;  %v3098_v40 = vrot.slane %v3084_v50, %v7237_v61  ;;  %v5235_v50 = vpack.c.bf16 %v4102_v43, %v4101_v2 }
 0x6d5   : > { %4984 = vmatmul.mubr.msk.f32.vlgmr.msra.gmra.mrb[26].mxu1 %vm1311_vm2, %v3100_v9  ;;  %5195 = vmatprep.subr.bf16.mxu0 %v6223_v0 }
 0x6d6   : > { %5194 = vmatpush3.bf16.msra.mxu1 %v7333_v32  ;;  %4997 = vmatprep.mubr.msk.f32.mxu1 %vm6224_vm0, %v6225_v1  ;;  %v3102_v32 = vcombine.high %v3098_v40, %v6225_v1 }
 0x6d7   : > { %4991 = vmatmul.mubr.msk.f32.vlgmr.msra.gmra.mrb[24].mxu0 %vm1311_vm2, %v3091_v5  ;;  %5198 = vmatprep.subr.bf16.mxu1 %v6223_v0 }
 0x6d8   : > { %5197 = vmatpush3.bf16.msra.mxu0 %v7341_v8  ;;  %5004 = vmatprep.mubr.msk.f32.mxu0 %vm6224_vm0, %v6225_v1  ;;  %v3755_v8 = vld [vmem:[#allocation20] sm:$0xff] }
 0x6d9   : > { %4998 = vmatmul.mubr.msk.f32.vlgmr.msra.gmra.mrb[28].mxu1 %vm1311_vm2, %v3101_v39  ;;  %5201 = vmatprep.subr.bf16.mxu0 %v6223_v0 }
 0x6da   : > { %5200 = vmatpush3.bf16.msra.mxu1 %v7359_v33  ;;  %5011 = vmatprep.mubr.msk.f32.mxu1 %vm6224_vm0, %v6225_v1  ;;  %v5202_v33 = vpack.c.bf16 %v3756_v4, %v3755_v8 }
 0x6db   : > { %5005 = vmatmul.mubr.msk.f32.vlgmr.msra.gmra.mrb[26].mxu0 %vm1311_vm2, %v3098_v40  ;;  %5207 = vmatprep.subr.bf16.mxu1 %v6223_v0 }
 0x6dc   : > { %5022 = vmatprep.mubr.msk.f32.mxu0 %vm6224_vm0, %v6225_v1  ;;  %5203 = vmatpush3.bf16.msra.mxu0 %v5202_v33 }
 0x6dd   : > { %5012 = vmatmul.mubr.msk.f32.vlgmr.msra.gmra.mrb[30].mxu1 %vm1311_vm2, %v3102_v32  ;;  %5204 = vmatprep.subr.bf16.mxu0 %v6223_v0 }
 0x6de   : > { %5033 = vmatprep.mubr.msk.f32.mxu1 %vm6224_vm0, %v6225_v1  ;;  %5209 = vmatpush3.bf16.msra.mxu1 %v5202_v33 }
 0x6df   : > { %5210 = vmatprep.subr.bf16.mxu1 %v6223_v0 }
 0x6e0   : > { %5206 = vmatpush3.bf16.msra.mxu0 %v5205_v21 }
 0x6e1   : > { %5213 = vmatprep.subr.bf16.mxu0 %v6223_v0 }
 0x6e2   : > { %5212 = vmatpush3.bf16.msra.mxu1 %v5205_v21 }
 0x6e3   : > { %5219 = vmatprep.subr.bf16.mxu1 %v6223_v0 }
 0x7a2   : > { %v3172_v13 = vpop.f32.mrb[20].mxu0 }
 0x7a3   : > { %v4964_v41 = vpop.f32.mrb[21].mxu0 }
 0x7a4   : > { %v3245_v63 = vpop.f32.mrb[24].mxu1 }
 0x7a5   : > { %v4971_v49 = vpop.f32.mrb[25].mxu1 }
 0x7a6   : > { %v3318_v16 = vpop.f32.mrb[22].mxu0 }
 0x7a7   : > { %v3687_v7 = vcombine.low %v3172_v13, %v3318_v16  ;;  %v4978_v15 = vpop.f32.mrb[23].mxu0  ;;  %v4594_v13 = vld [vmem:[#allocation24] ss:$0 sm:$0xff] }
 0x7a8   : > { %v3391_v55 = vpop.f32.mrb[26].mxu1 }
 0x7a9   : > { %v3695_v26 = vcombine.low %v3245_v63, %v3391_v55  ;;  %v4985_v34 = vpop.f32.mrb[27].mxu1  ;;  %v3694_v48 = vrot.slane %v3687_v7, %v7192_v57 }
 0x7aa   : > { %v3464_v28 = vpop.f32.mrb[24].mxu0 }
 0x7ab   : > { %v3702_v31 = vrot.slane %v3695_v26, %v7192_v57  ;;  %v4992_v56 = vpop.f32.mrb[25].mxu0 }
 0x7ac   : > { %v3537_v30 = vpop.f32.mrb[28].mxu1 }
 0x7ad   : > { %v3719_v35 = vcombine.low %v3694_v48, %v3702_v31  ;;  %v3720_v46 = vcombine.high %v3694_v48, %v3702_v31  ;;  %v4999_v12 = vpop.f32.mrb[29].mxu1 }
 0x7ae   : > { %v3610_v19 = vpop.f32.mrb[26].mxu0 }
 0x7af   : > { %v3703_v18 = vcombine.low %v3464_v28, %v3610_v19  ;;  %v5006_v51 = vpop.f32.mrb[27].mxu0  ;;  %v3727_v52 = vrot.slane %v3719_v35, %v7237_v61  ;;  %v3734_v6 = vrot.slane %v3720_v46, %v7237_v61  ;;  %v4597_v46 = vld [vmem:[#allocation27] ss:$0 sm:$0xff] }
 0x7b0   : > { %v3683_v20 = vpop.f32.mrb[30].mxu1 }
 0x7b1   : > { %v3711_v36 = vcombine.low %v3537_v30, %v3683_v20  ;;  %v5013_v14 = vpop.f32.mrb[31].mxu1  ;;  %v3710_v22 = vrot.slane %v3703_v18, %v7192_v57 }
 0x7b3   : > { %v3718_v25 = vrot.slane %v3711_v36, %v7192_v57  ;;  %v4095_v57 = vld [vmem:[#allocation23] sm:$0xff] }
 0x7b5   : > { %v3735_v53 = vcombine.low %v3710_v22, %v3718_v25  ;;  %v3736_v10 = vcombine.high %v3710_v22, %v3718_v25 }
 0x7b7   : > { %v3743_v44 = vrot.slane %v3735_v53, %v7237_v61  ;;  %v3750_v24 = vrot.slane %v3736_v10, %v7237_v61  ;;  %v4096_v61 = vld [vmem:[#allocation23 + $0x8] sm:$0xff] }
 0x7b8   : > { %v5226_v38 = vpack.c.bf16 %v4096_v61, %v4095_v57 }
 0x7b9   : > { %v3751_v45 = vcombine.low %v3727_v52, %v3743_v44  ;;  %v3752_v11 = vcombine.high %v3727_v52, %v3743_v44  ;;  %v3753_v37 = vcombine.low %v3734_v6, %v3750_v24  ;;  %v3754_v42 = vcombine.high %v3734_v6, %v3750_v24 }
 0x7bb   : > { %5023 = vmatmul.mubr.msk.f32.vlgmr.msra.gmra.mrb[16].mxu0 %vm1032_vm3, %v3751_v45  ;;  %5034 = vmatmul.mubr.msk.f32.vlgmr.msra.gmra.mrb[20].mxu1 %vm1032_vm3, %v3752_v11 }
 0x7bc   : > { %5215 = vmatpush3.bf16.msra.mxu0 %v5202_v33  ;;  %5221 = vmatpush3.bf16.msra.mxu1 %v5202_v33 }
 0x7bd   : > { %5216 = vmatprep.subr.bf16.mxu0 %v6223_v0  ;;  %5222 = vmatprep.subr.bf16.mxu1 %v6223_v0 }
 0x7be   : > { %5044 = vmatprep.mubr.msk.f32.mxu0 %vm6224_vm0, %v6225_v1  ;;  %5055 = vmatprep.mubr.msk.f32.mxu1 %vm6224_vm0, %v6225_v1 }
 0x7c0   : > { %5218 = vmatpush3.bf16.msra.mxu0 %v5205_v21  ;;  %5224 = vmatpush3.bf16.msra.mxu1 %v5205_v21 }
 0x7c1   : > { %5225 = vmatprep.subr.bf16.mxu0 %v6223_v0 }
 0x7c3   : > { %5045 = vmatmul.mubr.msk.f32.vlgmr.msra.gmra.mrb[18].mxu0 %vm1032_vm3, %v3753_v37  ;;  %5056 = vmatmul.mubr.msk.f32.vlgmr.msra.gmra.mrb[22].mxu1 %vm1032_vm3, %v3754_v42 }
 0x7c4   : > { %5074 = vmatprep.mubr.msk.f32.mxu0 %vm6224_vm0, %v6225_v1  ;;  %5227 = vmatpush3.bf16.msra.mxu0 %v5226_v38 }
 0x7c5   : > { %5228 = vmatprep.subr.bf16.mxu0 %v6223_v0 }
 0x7c8   : > { %5230 = vmatpush3.bf16.msra.mxu0 %v5229_v58 }
 0x7c9   : > { %5231 = vmatprep.subr.bf16.mxu0 %v6223_v0 }
 0x7cc   : > { %5233 = vmatpush3.bf16.msra.mxu0 %v5232_v60 }
 0x7cd   : > { %5234 = vmatprep.subr.bf16.mxu0 %v6223_v0 }
 0x7d0   : > { %5236 = vmatpush3.bf16.msra.mxu0 %v5235_v50 }
 0x88e   : > { %v3828_v59 = vpop.f32.mrb[16].mxu0  ;;  %v3907_v9 = vpop.f32.mrb[20].mxu1 }
 0x88f   : > { %3833 = vst.msk [vmem:[#allocation2] sm:$0xff] %vm1311_vm2, %v3828_v59  ;;  %3913 = vrot.lane.b32.xlu0 %v3907_v9, %s6232_s4  ;;  %v5024_v1 = vpop.f32.mrb[17].mxu0  ;;  %v5035_v5 = vpop.f32.mrb[21].mxu1 }
 0x896   : > { %v3991_v39 = vpop.f32.mrb[18].mxu0  ;;  %v4075_v40 = vpop.f32.mrb[22].mxu1 }
 0x897   : > { %4081 = vrot.lane.b32.xlu0 %v4075_v40, %s6233_s3  ;;  %v5057_v32 = vpop.f32.mrb[23].mxu1  ;;  %3997 = vrot.lane.b32.xlu1 %v3991_v39, %s6234_s15  ;;  %v5046_v8 = vpop.f32.mrb[19].mxu0 }
 0x901   : > { %v3914_v4 = vpop.permute.xlu0 %3913 }
 0x902   : > { %3917 = vst.msk [vmem:[#allocation2] sm:$0xff] %vm3916_vm6, %v3914_v4 }
 0x909   : > { %v4082_v33 = vpop.permute.xlu0 %4081  ;;  %v3998_v3 = vpop.permute.xlu1 %3997 }
 0x90a   : > { %4001 = vst.msk [vmem:[#allocation2] sm:$0xff] %vm4000_vm7, %v3998_v3 }
 0x90b   : > { %4085 = vst.msk [vmem:[#allocation2] sm:$0xff] %vm4084_vm8, %v4082_v33 }
 0x912   : > { %v4086_v0 = vld [vmem:[#allocation2] sm:$0xff] }
 0x913   : > { %v4094_v21 = vadd.f32 %v4593_v17, %v4086_v0 }
 0x915   : > { %5075 = vmatmul.mubr.msk.f32.vlgmr.msra.gmra.mrb[28].mxu0 %vm830_vm1, %v4094_v21 }
 0x9e8   : > { %v4179_v41 = vpop.f32.mrb[28].mxu0 }
 0x9e9   : > { %v4180_v63 = vadd.f32 %v4594_v13, %v4179_v41  ;;  %v5076_v49 = vpop.f32.mrb[29].mxu0 }
 0x9eb   : > { %v4183_v16 = vmax.f32 %v4180_v63, 0.0 }
 0x9ed   : > { %v4184_v7 = vadd.f32 %v4183_v16, %v814_v29  ;;  %v4596_v29 = vld [vmem:[#allocation26] ss:$0 sm:$0xff] }
 0x9ef   : > { %v4185_v15 = vsel %vm830_vm1, %v4184_v7, 0.0 }
 0x9f0   : > { %4186 = vadd.xlane.f32.xlu1 %v4185_v15 }
 0xa7d   : > { %v4187_v55 = vpop.xlane.xlu1 %4186 }
 0xa7e   : > { %v4189_v26 = vmul.f32 0.015625, %v4187_v55 }
 0xa80   : > { %v4190_v34 = vsub.f32 %v4184_v7, %v4189_v26 }
 0xa82   : > { %v4191_v28 = vmul.f32 %v4190_v34, %v4190_v34 }
 0xa84   : > { %v4192_v48 = vsel %vm830_vm1, %v4191_v28, 0.0 }
 0xa85   : > { %4193 = vadd.xlane.f32.xlu0 %v4192_v48 }
 0xb12   : > { %v4194_v31 = vpop.xlane.xlu0 %4193 }
 0xb13   : > { %v4195_v56 = vmul.f32 0.015625, %v4194_v31 }
 0xb15   : > { %v4196_v30 = vadd.f32 1e-05, %v4195_v56 }
 0xb17   : > { %5587 = vrsqrt.f32 %v4196_v30 }
 0xb21   : > { %v5588_v27 = vpop.eup %5587 }
 0xb22   : > { %v4198_v35 = vmul.f32 %v5588_v27, %v4190_v34 }
 0xb24   : > { %v4206_v12 = vmul.f32 %v4596_v29, %v4198_v35 }
 0xb26   : > { %v4214_v19 = vadd.f32 %v4597_v46, %v4206_v12 }
 0xb28   : > { %4215 = vst.msk [vmem:[%s802_s2] sm:$0xff] %vm830_vm1, %v4214_v19 }
 0xb29   : > { %6056 = shalt.err (!%p6053_p4)
}
 0xb2a   : > { %s6057_s27 = scalar_lea.hbm %s7562_s1, 128  ;;  %s6061_s4 = scalar_lea.hbm %s7776_s11, 512 }
 0xb2b   : > { %p6058_p6 = scmp.ne.s32.totalorder %s7562_s1, %s6057_s27  ;;  %p6062_p8 = scmp.lt.u32.totalorder %s7562_s1, %s7776_s11 }
 0xb2c   : > { %p6063_p11 = scmp.lt.u32.totalorder %s6061_s4, %s6057_s27  ;;  %p6065_p13 = scmp.lt.u32.totalorder %s6057_s27, %s7562_s1 }
 0xb2d   : > { %p6059_p10 = pnand %p6058_p6, %p7777_p3 }
 0xb2e   : > { %p6064_p2 = por %p6063_p11, %p6062_p8 }
 0xb2f   : > { %p6060_p12 = pneg %p6059_p10 }
 0xb30   : > { %p6066_p1 = por %p6065_p13, %p6064_p2 }
 0xb32   : > { %p6067_p9 = pnand %p6066_p1, %p6060_p12 }
 0xb34   : > { %6070 = shalt.err (!%p6067_p9)
}
 0xb35   : > { %5303 = dma.vmem_to_hbm [thread:$0]  (%p7777_p3), %s7564_s7, 128, %s7562_s1, %s4217_s24  }
 0xb36 PF: > { %p5386_p0 = scmp.ge.s32.totalorder %s6201_s0, 2  ;;  %s4244_s13 = sand.u32 1, %s6161_s21  }
 0xb37   : > { %p7778_p7 = scmp.ne.s32.totalorder %s7721_s10, 0  ;;  %s4245_s20 = scalar_lea.sflag [#allocation5], %s4244_s13 }
 0xb39   : > { %p5356_p5 = pnand %p5386_p0, %p7778_p7 }
 0xb3b   : > { %6156 = dma.done.wait (!%p5356_p5), %s4245_s20, 128  }
 0xb3c   : > { %6158 = vsyncadd (!%p5356_p5), %s4245_s20, 4294967168  ;;  %s42_s0 = sadd.s32 1, %s6201_s0   ;;  %s7779_s12 = sld [smem:[#allocation50_spill]] }
 0xb3d   : > { %p39_p4 = scmp.ge.s32.totalorder %s42_s0, 6   ;;  %s7780_s24 = sld [smem:[#allocation42_spill]] }
 0xb3e   : > { %s7781_s25 = sld [smem:[#allocation43_spill]]  ;;  %s7782_s27 = sld [smem:[#allocation46_spill]] }
 0xb3f   : > { %s7783_s29 = sld [smem:[#allocation48_spill]]  ;;  %s7784_s14 = sld [smem:[#allocation49_spill]] }
 0xb40   : > { %s7785_s21 = smov %s6165_s22  ;;  %s7786_s22 = smov %s6169_s23 }
 0xb41   : > { %s7788_s26 = smov %s6772_s16  ;;  %s7789_s28 = smov %s6197_s30 }
 0xb42   : > { %s7787_s23 = smov %s7779_s12  ;;  %41 = sbr.rel (!%p39_p4) target bundleno = 36 (0x24), region = 206 }
 0xb45   : > { %s7790_s30 = smov %s7784_s14 }
 0xb49   :  { %4250 = vsyncpa [#allocation4], 1 }
 0xb4a   :  { %4252 = vsyncpa [#allocation4 + $0x1], 1 }
 0xb4b   :  { %4253 = vsyncpa [#allocation7], 1 }
 0xb4c   :  { %4255 = vsyncpa [#allocation7 + $0x1], 1 }
 0xb4d   :  { %4256 = vsyncpa [#allocation10], 1 }
 0xb4e   :  { %4257 = vsyncpa [#allocation13], 1 }
 0xb4f   :  { %4258 = vsyncpa [#allocation16], 1 }
 0xb50   :  { %4259 = vsyncpa [#allocation19], 1 }
 0xb51   :  { %4260 = vsyncpa [#allocation22], 1 }
 0xb52   :  { %4261 = vsyncpa [#allocation25], 1 }
 0xb53   :  { %4262 = vsyncpa [#allocation28], 1 }
 0xb54   :  { %4263 = vsyncpa [#allocation5], 1 }
 0xb55   :  { %4265 = vsyncpa [#allocation5 + $0x1], 1 }

</bundles_post_ra>
